<compile_context>
chip_gen: v5e
topology: v5e:2x2
jax: 0.10.0
libtpu: 0.0.40
codegen_flags: <defaults>
</compile_context>

<pallas_src>
import math

import jax
import jax.numpy as jnp
from jax.experimental import pallas as pl
from jax.experimental.pallas import tpu as pltpu


# ----------------------------------------------------------------------------
# small helpers
# ----------------------------------------------------------------------------
def _round_up(a, b):
    return ((a + b - 1) // b) * b


def _pick_btile(n, cap=4):
    """Largest tile <= cap that divides n while keeping >= 2 grid steps (v7x megacore)."""
    if n <= 1:
        return 1
    best = 1
    t = 1
    while t <= min(cap, n // 2):
        if n % t == 0:
            best = t
        t += 1
    return best


def bn_fold(gamma, beta, mean, var, eps=1e-5):
    scale = gamma / jnp.sqrt(var + eps)
    shift = beta - mean * scale
    return scale, shift


def _im2col_slices(x, k, stride, pad):
    """x: [N,H,W,C] NHWC -> list of k*k shifted slices [N,Ho,Wo,C] (ordered (ki,kj)), Ho, Wo."""
    N, H, W, C = x.shape
    xp = jnp.pad(x, ((0, 0), (pad, pad), (pad, pad), (0, 0)))
    Ho = (H + 2 * pad - k) // stride + 1
    Wo = (W + 2 * pad - k) // stride + 1
    cols = [xp[:, ki:ki + stride * Ho:stride, kj:kj + stride * Wo:stride, :]
            for ki in range(k) for kj in range(k)]
    return cols, Ho, Wo


# ----------------------------------------------------------------------------
# The single fused kernel: stem matmul -> maxpool -> bottleneck -> avg-pool -> FC head
# ----------------------------------------------------------------------------
def _make_fused_kernel(n_fc, b_tile, side_s):
    side_p = side_s // 2          # 8
    hw_s = side_s * side_s        # 256
    hw_p = side_p * side_p        # 64

    def kernel(p_ref, ws_ref, ss_ref, wdc_ref, sdc_ref, w2_ref, s2_ref,
               w3_ref, s3_ref, *rest):
        fc_refs = rest[:2 * n_fc]
        o_ref = rest[2 * n_fc]
        B = b_tile
        c_stem = ws_ref.shape[-1]         # 64
        n_ds = w3_ref.shape[-1]           # 256 (expansion / shortcut channels)
        c_mid = w2_ref.shape[-1]          # 64

        # 1) stem 7x7/2 conv (+ folded-BN shift, ReLU) as one [B*256, 256]x[256, 64] matmul.
        p2 = p_ref[...].reshape(B * hw_s, p_ref.shape[-1])
        stem = jnp.dot(p2, ws_ref[...], preferred_element_type=jnp.float32) + ss_ref[...]
        stem = jnp.maximum(stem, 0.0)
        x = stem.reshape(B, side_s, side_s, c_stem)                    # [B,16,16,64] f32, >= 0

        # 2) 3x3/2 maxpool, pad=1, fused in-kernel.  Zero-fill at borders is exact because the
        #    input is post-ReLU (>= 0).  H handled with outer-dim ops; W with +/-1 sublane shifts.
        zw = jnp.zeros((B, side_s, 1, c_stem), jnp.float32)
        xl = jnp.concatenate([zw, x[:, :, :side_s - 1, :]], axis=2)    # w-1
        xr = jnp.concatenate([x[:, :, 1:, :], zw], axis=2)             # w+1
        mw = jnp.maximum(jnp.maximum(x, xl), xr)                       # W-window max
        mw = mw.reshape(B, side_p, 2, side_s, c_stem)
        ev, od = mw[:, :, 0], mw[:, :, 1]                              # rows 2i / 2i+1
        zh = jnp.zeros((B, 1, side_s, c_stem), jnp.float32)
        odm = jnp.concatenate([zh, od[:, :side_p - 1]], axis=1)        # rows 2i-1
        mh = jnp.maximum(jnp.maximum(ev, od), odm)                     # [B,8,16,64]
        pooled = jnp.concatenate(
            [mh[:, :, 2 * j:2 * j + 1, :] for j in range(side_p)], axis=2)   # even w -> [B,8,8,64]
        xp = pooled.reshape(B * hw_p, c_stem).astype(jnp.bfloat16)            # [M2, 64]

        # 3) downsample (1x1 BN) || conv1 (1x1 BN + ReLU) as ONE lane-dense [M2, 320] matmul.
        h = jnp.dot(xp, wdc_ref[...], preferred_element_type=jnp.float32) + sdc_ref[...]
        identity = h[:, :n_ds].astype(jnp.bfloat16)        # shortcut, bf16 to cut vreg pressure
        y1 = jnp.maximum(h[:, n_ds:], 0.0)                 # [M2, 64] f32
        y1 = y1.reshape(B, side_p, side_p, c_mid)

        # 4) 3x3 conv (pad 1) as ONE [M2, 576] x [576, 64] matmul: 9 shifted taps concatenated
        #    along lanes (zero-fill at borders == the conv's zero padding).
        zh2 = jnp.zeros((B, 1, side_p, c_mid), jnp.float32)
        zw2 = jnp.zeros((B, side_p, 1, c_mid), jnp.float32)
        taps = []
        for di in range(3):
            if di == 0:
                sh = jnp.concatenate([zh2, y1[:, :side_p - 1]], axis=1)
            elif di == 1:
                sh = y1
            else:
                sh = jnp.concatenate([y1[:, 1:], zh2], axis=1)
            for dj in range(3):
                if dj == 0:
                    t = jnp.concatenate([zw2, sh[:, :, :side_p - 1, :]], axis=2)
                elif dj == 1:
                    t = sh
                else:
                    t = jnp.concatenate([sh[:, :, 1:, :], zw2], axis=2)
                taps.append(t.astype(jnp.bfloat16))
        x2 = jnp.concatenate(taps, axis=-1).reshape(B * hw_p, 9 * c_mid)      # [M2, 576]
        y2 = jnp.dot(x2, w2_ref[...], preferred_element_type=jnp.float32) + s2_ref[...]
        y2 = jnp.maximum(y2, 0.0).astype(jnp.bfloat16)                        # [M2, 64]

        # 5) conv3 (1x1 BN) + residual add + ReLU, then adaptive avg-pool to 1x1 (+ flatten).
        y3 = jnp.dot(y2, w3_ref[...], preferred_element_type=jnp.float32) + s3_ref[...]
        y3 = jnp.maximum(y3 + identity.astype(jnp.float32), 0.0)              # [M2, 256]
        feat = jnp.mean(y3.reshape(B, hw_p, n_ds), axis=1)                    # [B, 256]

        # 6) ExponentialFCBlock (eval: Dropout = identity).  Pad LHS rows to 8 sublanes only if
        #    the per-step batch is smaller than one sublane tile.
        if B < 8:
            feat = jnp.concatenate(
                [feat, jnp.zeros((8 - B, n_ds), jnp.float32)], axis=0)
        hfc = feat
        for li in range(n_fc):
            w_r = fc_refs[2 * li]
            b_r = fc_refs[2 * li + 1]
            hfc = jnp.dot(hfc.astype(jnp.bfloat16), w_r[...],
                          preferred_element_type=jnp.float32) + b_r[...]
            if li < n_fc - 1:
                hfc = jnp.maximum(hfc, 0.0)

        # write only the real rows; integer leading index avoids any minor-dim reshape.
        for bb in range(B):
            o_ref[bb, :, :] = hfc[bb:bb + 1, :].astype(o_ref.dtype)

    return kernel


def fused_forward(patches, fp, side, b_tile=None):
    N, hw, K = patches.shape
    if b_tile is None:
        b_tile = _pick_btile(N)
    assert N % b_tile == 0
    n_fc = len(fp["fc"])
    out_dim = fp["fc"][-1][0].shape[-1]
    kernel = _make_fused_kernel(n_fc=n_fc, b_tile=b_tile, side_s=side)

    in_specs = [
        pl.BlockSpec((b_tile, hw, K), lambda i: (i, 0, 0)),
        pl.BlockSpec(fp["stem_w"].shape, lambda i: (0, 0)),
        pl.BlockSpec(fp["stem_shift"].shape, lambda i: (0, 0)),
        pl.BlockSpec(fp["wdc"].shape, lambda i: (0, 0)),
        pl.BlockSpec(fp["sdc"].shape, lambda i: (0, 0)),
        pl.BlockSpec(fp["w2"].shape, lambda i: (0, 0)),
        pl.BlockSpec(fp["s2"].shape, lambda i: (0, 0)),
        pl.BlockSpec(fp["w3"].shape, lambda i: (0, 0)),
        pl.BlockSpec(fp["s3"].shape, lambda i: (0, 0)),
    ]
    args = [patches, fp["stem_w"], fp["stem_shift"], fp["wdc"], fp["sdc"],
            fp["w2"], fp["s2"], fp["w3"], fp["s3"]]
    for w, b in fp["fc"]:
        in_specs.append(pl.BlockSpec(w.shape, lambda i: (0, 0)))
        in_specs.append(pl.BlockSpec(b.shape, lambda i: (0, 0)))
        args.extend([w, b])

    out = pl.pallas_call(
        kernel,
        out_shape=jax.ShapeDtypeStruct((N, 1, out_dim), jnp.float32),
        grid=(N // b_tile,),
        in_specs=in_specs,
        out_specs=pl.BlockSpec((b_tile, 1, out_dim), lambda i: (i, 0, 0)),
        compiler_params=pltpu.CompilerParams(dimension_semantics=("parallel",)),
    )(*args)
    return out.reshape(N, out_dim)


# ----------------------------------------------------------------------------
# Parameter init (deterministic, PyTorch layouts) and folding into kernel layouts
# ----------------------------------------------------------------------------
def make_bn(key, c):
    k1, k2, k3, k4 = jax.random.split(key, 4)
    gamma = jax.random.uniform(k1, (c,), minval=0.5, maxval=1.5)
    beta = 0.1 * jax.random.normal(k2, (c,))
    mean = 0.1 * jax.random.normal(k3, (c,))
    var = jax.random.uniform(k4, (c,), minval=0.5, maxval=1.5)
    return bn_fold(gamma, beta, mean, var)


def make_params(key, num_classes, num_fc_layers):
    ks = jax.random.split(key, 16)
    p = {}
    p["conv1_w"] = 0.05 * jax.random.normal(ks[0], (64, 3, 7, 7))
    p["bn1"] = make_bn(ks[1], 64)
    # bottleneck (layer1.0 of ResNet-50): 64 -> 64 -> 64 -> 256 with projection shortcut
    p["b_c1_w"] = 0.1 * jax.random.normal(ks[2], (64, 64, 1, 1))
    p["b_bn1"] = make_bn(ks[3], 64)
    p["b_c2_w"] = 0.05 * jax.random.normal(ks[4], (64, 64, 3, 3))
    p["b_bn2"] = make_bn(ks[5], 64)
    p["b_c3_w"] = 0.1 * jax.random.normal(ks[6], (256, 64, 1, 1))
    p["b_bn3"] = make_bn(ks[7], 256)
    p["b_ds_w"] = 0.1 * jax.random.normal(ks[8], (256, 64, 1, 1))
    p["b_ds_bn"] = make_bn(ks[9], 256)

    # ExponentialFCBlock: widths log2-spaced between in_features and the output dim
    in_features = 256
    out_dim = 1 if num_classes == 2 else num_classes
    lo, hi = math.log2(max(out_dim, 2)), math.log2(in_features)
    dims = [in_features]
    for i in range(1, num_fc_layers):
        t = i / num_fc_layers
        dims.append(int(2 ** round(hi * (1 - t) + lo * t)))
    dims.append(out_dim)
    fc = []
    kfc = jax.random.split(ks[10], len(dims) - 1)
    for i in range(len(dims) - 1):
        kw, kb = jax.random.split(kfc[i])
        w = (1.0 / math.sqrt(dims[i])) * jax.random.normal(kw, (dims[i + 1], dims[i]))
        b = 0.01 * jax.random.normal(kb, (dims[i + 1],))
        fc.append((w, b))
    p["fc"] = fc
    return p


def prepare_params(p):
    """Fold BN scale into weight columns, transpose to [K, N] matmul layout, concatenate the
    downsample + conv1 weights into one lane-dense 320-column matmul, reshape the 3x3 conv into
    a single [576, 64] contraction, cast MXU operands to bf16 (shifts / biases stay f32)."""
    fp = {}
    cout1 = p["conv1_w"].shape[0]
    s1, sh1 = p["bn1"]
    wm1 = jnp.transpose(p["conv1_w"], (2, 3, 1, 0)).reshape(-1, cout1) * s1[None, :]
    k_pad = _round_up(wm1.shape[0], 128)                 # 147 -> 256: aligned MXU contraction
    wm1 = jnp.pad(wm1, ((0, k_pad - wm1.shape[0]), (0, 0)))
    fp["stem_w"] = wm1.astype(jnp.bfloat16)
    fp["stem_shift"] = sh1.reshape(1, -1).astype(jnp.float32)

    sds, shds = p["b_ds_bn"]
    sc1, shc1 = p["b_bn1"]
    w_ds = p["b_ds_w"][:, :, 0, 0].T * sds[None, :]      # [64, 256]
    w_c1 = p["b_c1_w"][:, :, 0, 0].T * sc1[None, :]      # [64, 64]
    fp["wdc"] = jnp.concatenate([w_ds, w_c1], axis=1).astype(jnp.bfloat16)     # [64, 320]
    fp["sdc"] = jnp.concatenate([shds, shc1]).reshape(1, -1).astype(jnp.float32)

    s2, sh2 = p["b_bn2"]
    w2 = p["b_c2_w"]                                     # [64, 64, 3, 3] OIHW
    fp["w2"] = jnp.concatenate(
        [w2[:, :, di, dj].T * s2[None, :] for di in range(3) for dj in range(3)],
        axis=0).astype(jnp.bfloat16)                     # [576, 64], tap-major contraction
    fp["s2"] = sh2.reshape(1, -1).astype(jnp.float32)

    s3, sh3 = p["b_bn3"]
    fp["w3"] = (p["b_c3_w"][:, :, 0, 0].T * s3[None, :]).astype(jnp.bfloat16)  # [64, 256]
    fp["s3"] = sh3.reshape(1, -1).astype(jnp.float32)

    fp["fc"] = [(w.T.astype(jnp.bfloat16), b.reshape(1, -1).astype(jnp.float32))
                for (w, b) in p["fc"]]
    return fp


# ----------------------------------------------------------------------------
# Forward pass (ResnetClassifier.forward, eval semantics)
# ----------------------------------------------------------------------------
def resnet_classifier_forward(x_nchw, fp, b_tile=None):
    N = x_nchw.shape[0]
    x = jnp.transpose(x_nchw, (0, 2, 3, 1)).astype(jnp.bfloat16)      # NCHW -> NHWC, bf16 operands

    # im2col patches for the stem 7x7/2 conv (built once in XLA; K zero-padded 147 -> 256).
    cols, Ho, Wo = _im2col_slices(x, 7, 2, 3)                         # 49 x [N,16,16,3]
    k_raw = 7 * 7 * x.shape[-1]
    k_pad = fp["stem_w"].shape[0]
    if k_pad > k_raw:
        cols.append(jnp.zeros((N, Ho, Wo, k_pad - k_raw), jnp.bfloat16))
    patches = jnp.concatenate(cols, axis=-1).reshape(N, Ho * Wo, k_pad)   # [N, 256, 256]

    # everything else (stem matmul, maxpool, bottleneck, avg-pool, FC head) is ONE fused kernel.
    return fused_forward(patches, fp, side=Ho, b_tile=b_tile)             # logits [N, out_dim]


if __name__ == "__main__":
    num_classes = 10
    num_fc_layers = 2
    key = jax.random.PRNGKey(0)
    kx, kp = jax.random.split(key)

    # input_shape = (3, 32, 32), batch = 2
    x = jax.random.normal(kx, (2, 3, 32, 32), dtype=jnp.float32)
    params = prepare_params(make_params(kp, num_classes, num_fc_layers))

    fwd = jax.jit(resnet_classifier_forward)
    logits = jax.block_until_ready(fwd(x, params))
    assert logits.shape == (2, num_classes)
    assert bool(jnp.all(jnp.isfinite(logits)))
    print("KERNEL_OK")
</pallas_src>

<mosaic_0001>
module attributes {stable_mosaic.version = 11 : i64} {
  func.func @kernel(%arg0: i32, %arg1: memref<1x256x256xbf16, #tpu.memory_space<vmem>>, %arg2: memref<256x64xbf16, #tpu.memory_space<vmem>>, %arg3: memref<1x64xf32, #tpu.memory_space<vmem>>, %arg4: memref<64x320xbf16, #tpu.memory_space<vmem>>, %arg5: memref<1x320xf32, #tpu.memory_space<vmem>>, %arg6: memref<576x64xbf16, #tpu.memory_space<vmem>>, %arg7: memref<1x64xf32, #tpu.memory_space<vmem>>, %arg8: memref<64x256xbf16, #tpu.memory_space<vmem>>, %arg9: memref<1x256xf32, #tpu.memory_space<vmem>>, %arg10: memref<256x64xbf16, #tpu.memory_space<vmem>>, %arg11: memref<1x64xf32, #tpu.memory_space<vmem>>, %arg12: memref<64x10xbf16, #tpu.memory_space<vmem>>, %arg13: memref<1x10xf32, #tpu.memory_space<vmem>>, %arg14: memref<1x1x10xf32, #tpu.memory_space<vmem>>) attributes {dimension_semantics = [#tpu.dimension_semantics<parallel>], iteration_bounds = array<i64: 2>, scalar_prefetch = 0 : i64, scratch_operands = 0 : i64, tpu.core_type = #tpu.core_type<tc>, window_params = [{transform_indices = @transform_0, window_bounds = array<i64: 1, 256, 256>}, {pipeline_mode = #tpu.pipeline_mode<synchronous>, transform_indices = @transform_1, window_bounds = array<i64: 256, 64>}, {pipeline_mode = #tpu.pipeline_mode<synchronous>, transform_indices = @transform_2, window_bounds = array<i64: 1, 64>}, {pipeline_mode = #tpu.pipeline_mode<synchronous>, transform_indices = @transform_3, window_bounds = array<i64: 64, 320>}, {pipeline_mode = #tpu.pipeline_mode<synchronous>, transform_indices = @transform_4, window_bounds = array<i64: 1, 320>}, {pipeline_mode = #tpu.pipeline_mode<synchronous>, transform_indices = @transform_5, window_bounds = array<i64: 576, 64>}, {pipeline_mode = #tpu.pipeline_mode<synchronous>, transform_indices = @transform_6, window_bounds = array<i64: 1, 64>}, {pipeline_mode = #tpu.pipeline_mode<synchronous>, transform_indices = @transform_7, window_bounds = array<i64: 64, 256>}, {pipeline_mode = #tpu.pipeline_mode<synchronous>, transform_indices = @transform_8, window_bounds = array<i64: 1, 256>}, {pipeline_mode = #tpu.pipeline_mode<synchronous>, transform_indices = @transform_9, window_bounds = array<i64: 256, 64>}, {pipeline_mode = #tpu.pipeline_mode<synchronous>, transform_indices = @transform_10, window_bounds = array<i64: 1, 64>}, {pipeline_mode = #tpu.pipeline_mode<synchronous>, transform_indices = @transform_11, window_bounds = array<i64: 64, 10>}, {pipeline_mode = #tpu.pipeline_mode<synchronous>, transform_indices = @transform_12, window_bounds = array<i64: 1, 10>}, {transform_indices = @transform_13, window_bounds = array<i64: 1, 1, 10>}]} {
    %c0 = arith.constant 0 : index
    %c0_0 = arith.constant 0 : index
    %c0_1 = arith.constant 0 : index
    %0 = vector.load %arg1[%c0, %c0_0, %c0_1] : memref<1x256x256xbf16, #tpu.memory_space<vmem>>, vector<1x256x256xbf16>
    %1 = vector.shape_cast %0 : vector<1x256x256xbf16> to vector<256x256xbf16>
    %c0_2 = arith.constant 0 : index
    %c0_3 = arith.constant 0 : index
    %2 = vector.load %arg2[%c0_2, %c0_3] : memref<256x64xbf16, #tpu.memory_space<vmem>>, vector<256x64xbf16>
    %cst = arith.constant dense<0.000000e+00> : vector<256x64xf32>
    %3 = tpu.matmul %1, %2, %cst {dimension_numbers = #tpu.dot_dimension_numbers<[1], [0], [0], [1], [0, 0, 1, 1], [], []>} : vector<256x256xbf16>, vector<256x64xbf16>, vector<256x64xf32> -> vector<256x64xf32>
    %c0_4 = arith.constant 0 : index
    %c0_5 = arith.constant 0 : index
    %4 = vector.load %arg3[%c0_4, %c0_5] : memref<1x64xf32, #tpu.memory_space<vmem>>, vector<1x64xf32>
    %5 = vector.broadcast %4 : vector<1x64xf32> to vector<256x64xf32>
    %6 = arith.addf %3, %5 : vector<256x64xf32>
    %cst_6 = arith.constant 0.000000e+00 : f32
    %7 = vector.broadcast %cst_6 : f32 to vector<256x64xf32>
    %8 = arith.maximumf %6, %7 : vector<256x64xf32>
    %9 = vector.shape_cast %8 : vector<256x64xf32> to vector<1x16x16x64xf32>
    %cst_7 = arith.constant 0.000000e+00 : f32
    %10 = vector.broadcast %cst_7 : f32 to vector<1x16x1x64xf32>
    %11 = vector.extract_strided_slice %9 {offsets = [0, 0, 0, 0], sizes = [1, 16, 15, 64], strides = [1, 1, 1, 1]} : vector<1x16x16x64xf32> to vector<1x16x15x64xf32>
    %12 = tpu.concatenate %10, %11 in 2 : vector<1x16x1x64xf32>, vector<1x16x15x64xf32> -> vector<1x16x16x64xf32>
    %13 = vector.extract_strided_slice %9 {offsets = [0, 0, 1, 0], sizes = [1, 16, 15, 64], strides = [1, 1, 1, 1]} : vector<1x16x16x64xf32> to vector<1x16x15x64xf32>
    %14 = tpu.concatenate %13, %10 in 2 : vector<1x16x15x64xf32>, vector<1x16x1x64xf32> -> vector<1x16x16x64xf32>
    %15 = arith.maximumf %9, %12 : vector<1x16x16x64xf32>
    %16 = arith.maximumf %15, %14 : vector<1x16x16x64xf32>
    %17 = vector.shape_cast %16 : vector<1x16x16x64xf32> to vector<1x8x2x16x64xf32>
    %18 = vector.extract_strided_slice %17 {offsets = [0, 0, 0, 0, 0], sizes = [1, 8, 1, 16, 64], strides = [1, 1, 1, 1, 1]} : vector<1x8x2x16x64xf32> to vector<1x8x1x16x64xf32>
    %19 = vector.shape_cast %18 : vector<1x8x1x16x64xf32> to vector<1x8x16x64xf32>
    %20 = vector.extract_strided_slice %17 {offsets = [0, 0, 1, 0, 0], sizes = [1, 8, 1, 16, 64], strides = [1, 1, 1, 1, 1]} : vector<1x8x2x16x64xf32> to vector<1x8x1x16x64xf32>
    %21 = vector.shape_cast %20 : vector<1x8x1x16x64xf32> to vector<1x8x16x64xf32>
    %cst_8 = arith.constant 0.000000e+00 : f32
    %22 = vector.broadcast %cst_8 : f32 to vector<1x1x16x64xf32>
    %23 = vector.extract_strided_slice %21 {offsets = [0, 0, 0, 0], sizes = [1, 7, 16, 64], strides = [1, 1, 1, 1]} : vector<1x8x16x64xf32> to vector<1x7x16x64xf32>
    %24 = tpu.concatenate %22, %23 in 1 : vector<1x1x16x64xf32>, vector<1x7x16x64xf32> -> vector<1x8x16x64xf32>
    %25 = arith.maximumf %19, %21 : vector<1x8x16x64xf32>
    %26 = arith.maximumf %25, %24 : vector<1x8x16x64xf32>
    %27 = vector.extract_strided_slice %26 {offsets = [0, 0, 0, 0], sizes = [1, 8, 1, 64], strides = [1, 1, 1, 1]} : vector<1x8x16x64xf32> to vector<1x8x1x64xf32>
    %28 = vector.extract_strided_slice %26 {offsets = [0, 0, 2, 0], sizes = [1, 8, 1, 64], strides = [1, 1, 1, 1]} : vector<1x8x16x64xf32> to vector<1x8x1x64xf32>
    %29 = vector.extract_strided_slice %26 {offsets = [0, 0, 4, 0], sizes = [1, 8, 1, 64], strides = [1, 1, 1, 1]} : vector<1x8x16x64xf32> to vector<1x8x1x64xf32>
    %30 = vector.extract_strided_slice %26 {offsets = [0, 0, 6, 0], sizes = [1, 8, 1, 64], strides = [1, 1, 1, 1]} : vector<1x8x16x64xf32> to vector<1x8x1x64xf32>
    %31 = vector.extract_strided_slice %26 {offsets = [0, 0, 8, 0], sizes = [1, 8, 1, 64], strides = [1, 1, 1, 1]} : vector<1x8x16x64xf32> to vector<1x8x1x64xf32>
    %32 = vector.extract_strided_slice %26 {offsets = [0, 0, 10, 0], sizes = [1, 8, 1, 64], strides = [1, 1, 1, 1]} : vector<1x8x16x64xf32> to vector<1x8x1x64xf32>
    %33 = vector.extract_strided_slice %26 {offsets = [0, 0, 12, 0], sizes = [1, 8, 1, 64], strides = [1, 1, 1, 1]} : vector<1x8x16x64xf32> to vector<1x8x1x64xf32>
    %34 = vector.extract_strided_slice %26 {offsets = [0, 0, 14, 0], sizes = [1, 8, 1, 64], strides = [1, 1, 1, 1]} : vector<1x8x16x64xf32> to vector<1x8x1x64xf32>
    %35 = tpu.concatenate %27, %28, %29, %30, %31, %32, %33, %34 in 2 : vector<1x8x1x64xf32>, vector<1x8x1x64xf32>, vector<1x8x1x64xf32>, vector<1x8x1x64xf32>, vector<1x8x1x64xf32>, vector<1x8x1x64xf32>, vector<1x8x1x64xf32>, vector<1x8x1x64xf32> -> vector<1x8x8x64xf32>
    %36 = vector.shape_cast %35 : vector<1x8x8x64xf32> to vector<64x64xf32>
    %37 = arith.truncf %36 : vector<64x64xf32> to vector<64x64xbf16>
    %c0_9 = arith.constant 0 : index
    %c0_10 = arith.constant 0 : index
    %38 = vector.load %arg4[%c0_9, %c0_10] : memref<64x320xbf16, #tpu.memory_space<vmem>>, vector<64x320xbf16>
    %cst_11 = arith.constant dense<0.000000e+00> : vector<64x320xf32>
    %39 = tpu.matmul %37, %38, %cst_11 {dimension_numbers = #tpu.dot_dimension_numbers<[1], [0], [0], [1], [0, 0, 1, 1], [], []>} : vector<64x64xbf16>, vector<64x320xbf16>, vector<64x320xf32> -> vector<64x320xf32>
    %c0_12 = arith.constant 0 : index
    %c0_13 = arith.constant 0 : index
    %40 = vector.load %arg5[%c0_12, %c0_13] : memref<1x320xf32, #tpu.memory_space<vmem>>, vector<1x320xf32>
    %41 = vector.broadcast %40 : vector<1x320xf32> to vector<64x320xf32>
    %42 = arith.addf %39, %41 : vector<64x320xf32>
    %43 = vector.extract_strided_slice %42 {offsets = [0, 0], sizes = [64, 256], strides = [1, 1]} : vector<64x320xf32> to vector<64x256xf32>
    %44 = arith.truncf %43 : vector<64x256xf32> to vector<64x256xbf16>
    %45 = vector.extract_strided_slice %42 {offsets = [0, 256], sizes = [64, 64], strides = [1, 1]} : vector<64x320xf32> to vector<64x64xf32>
    %cst_14 = arith.constant 0.000000e+00 : f32
    %46 = vector.broadcast %cst_14 : f32 to vector<64x64xf32>
    %47 = arith.maximumf %45, %46 : vector<64x64xf32>
    %48 = vector.shape_cast %47 : vector<64x64xf32> to vector<1x8x8x64xf32>
    %cst_15 = arith.constant 0.000000e+00 : f32
    %49 = vector.broadcast %cst_15 : f32 to vector<1x1x8x64xf32>
    %cst_16 = arith.constant 0.000000e+00 : f32
    %50 = vector.broadcast %cst_16 : f32 to vector<1x8x1x64xf32>
    %51 = vector.extract_strided_slice %48 {offsets = [0, 0, 0, 0], sizes = [1, 7, 8, 64], strides = [1, 1, 1, 1]} : vector<1x8x8x64xf32> to vector<1x7x8x64xf32>
    %52 = tpu.concatenate %49, %51 in 1 : vector<1x1x8x64xf32>, vector<1x7x8x64xf32> -> vector<1x8x8x64xf32>
    %53 = vector.extract_strided_slice %52 {offsets = [0, 0, 0, 0], sizes = [1, 8, 7, 64], strides = [1, 1, 1, 1]} : vector<1x8x8x64xf32> to vector<1x8x7x64xf32>
    %54 = tpu.concatenate %50, %53 in 2 : vector<1x8x1x64xf32>, vector<1x8x7x64xf32> -> vector<1x8x8x64xf32>
    %55 = arith.truncf %54 : vector<1x8x8x64xf32> to vector<1x8x8x64xbf16>
    %56 = arith.truncf %52 : vector<1x8x8x64xf32> to vector<1x8x8x64xbf16>
    %57 = vector.extract_strided_slice %52 {offsets = [0, 0, 1, 0], sizes = [1, 8, 7, 64], strides = [1, 1, 1, 1]} : vector<1x8x8x64xf32> to vector<1x8x7x64xf32>
    %58 = tpu.concatenate %57, %50 in 2 : vector<1x8x7x64xf32>, vector<1x8x1x64xf32> -> vector<1x8x8x64xf32>
    %59 = arith.truncf %58 : vector<1x8x8x64xf32> to vector<1x8x8x64xbf16>
    %60 = vector.extract_strided_slice %48 {offsets = [0, 0, 0, 0], sizes = [1, 8, 7, 64], strides = [1, 1, 1, 1]} : vector<1x8x8x64xf32> to vector<1x8x7x64xf32>
    %61 = tpu.concatenate %50, %60 in 2 : vector<1x8x1x64xf32>, vector<1x8x7x64xf32> -> vector<1x8x8x64xf32>
    %62 = arith.truncf %61 : vector<1x8x8x64xf32> to vector<1x8x8x64xbf16>
    %63 = arith.truncf %48 : vector<1x8x8x64xf32> to vector<1x8x8x64xbf16>
    %64 = vector.extract_strided_slice %48 {offsets = [0, 0, 1, 0], sizes = [1, 8, 7, 64], strides = [1, 1, 1, 1]} : vector<1x8x8x64xf32> to vector<1x8x7x64xf32>
    %65 = tpu.concatenate %64, %50 in 2 : vector<1x8x7x64xf32>, vector<1x8x1x64xf32> -> vector<1x8x8x64xf32>
    %66 = arith.truncf %65 : vector<1x8x8x64xf32> to vector<1x8x8x64xbf16>
    %67 = vector.extract_strided_slice %48 {offsets = [0, 1, 0, 0], sizes = [1, 7, 8, 64], strides = [1, 1, 1, 1]} : vector<1x8x8x64xf32> to vector<1x7x8x64xf32>
    %68 = tpu.concatenate %67, %49 in 1 : vector<1x7x8x64xf32>, vector<1x1x8x64xf32> -> vector<1x8x8x64xf32>
    %69 = vector.extract_strided_slice %68 {offsets = [0, 0, 0, 0], sizes = [1, 8, 7, 64], strides = [1, 1, 1, 1]} : vector<1x8x8x64xf32> to vector<1x8x7x64xf32>
    %70 = tpu.concatenate %50, %69 in 2 : vector<1x8x1x64xf32>, vector<1x8x7x64xf32> -> vector<1x8x8x64xf32>
    %71 = arith.truncf %70 : vector<1x8x8x64xf32> to vector<1x8x8x64xbf16>
    %72 = arith.truncf %68 : vector<1x8x8x64xf32> to vector<1x8x8x64xbf16>
    %73 = vector.extract_strided_slice %68 {offsets = [0, 0, 1, 0], sizes = [1, 8, 7, 64], strides = [1, 1, 1, 1]} : vector<1x8x8x64xf32> to vector<1x8x7x64xf32>
    %74 = tpu.concatenate %73, %50 in 2 : vector<1x8x7x64xf32>, vector<1x8x1x64xf32> -> vector<1x8x8x64xf32>
    %75 = arith.truncf %74 : vector<1x8x8x64xf32> to vector<1x8x8x64xbf16>
    %76 = tpu.concatenate %55, %56, %59, %62, %63, %66, %71, %72, %75 in 3 : vector<1x8x8x64xbf16>, vector<1x8x8x64xbf16>, vector<1x8x8x64xbf16>, vector<1x8x8x64xbf16>, vector<1x8x8x64xbf16>, vector<1x8x8x64xbf16>, vector<1x8x8x64xbf16>, vector<1x8x8x64xbf16>, vector<1x8x8x64xbf16> -> vector<1x8x8x576xbf16>
    %77 = vector.shape_cast %76 : vector<1x8x8x576xbf16> to vector<64x576xbf16>
    %c0_17 = arith.constant 0 : index
    %c0_18 = arith.constant 0 : index
    %78 = vector.load %arg6[%c0_17, %c0_18] : memref<576x64xbf16, #tpu.memory_space<vmem>>, vector<576x64xbf16>
    %cst_19 = arith.constant dense<0.000000e+00> : vector<64x64xf32>
    %79 = tpu.matmul %77, %78, %cst_19 {dimension_numbers = #tpu.dot_dimension_numbers<[1], [0], [0], [1], [0, 0, 1, 1], [], []>} : vector<64x576xbf16>, vector<576x64xbf16>, vector<64x64xf32> -> vector<64x64xf32>
    %c0_20 = arith.constant 0 : index
    %c0_21 = arith.constant 0 : index
    %80 = vector.load %arg7[%c0_20, %c0_21] : memref<1x64xf32, #tpu.memory_space<vmem>>, vector<1x64xf32>
    %81 = vector.broadcast %80 : vector<1x64xf32> to vector<64x64xf32>
    %82 = arith.addf %79, %81 : vector<64x64xf32>
    %cst_22 = arith.constant 0.000000e+00 : f32
    %83 = vector.broadcast %cst_22 : f32 to vector<64x64xf32>
    %84 = arith.maximumf %82, %83 : vector<64x64xf32>
    %85 = arith.truncf %84 : vector<64x64xf32> to vector<64x64xbf16>
    %c0_23 = arith.constant 0 : index
    %c0_24 = arith.constant 0 : index
    %86 = vector.load %arg8[%c0_23, %c0_24] : memref<64x256xbf16, #tpu.memory_space<vmem>>, vector<64x256xbf16>
    %cst_25 = arith.constant dense<0.000000e+00> : vector<64x256xf32>
    %87 = tpu.matmul %85, %86, %cst_25 {dimension_numbers = #tpu.dot_dimension_numbers<[1], [0], [0], [1], [0, 0, 1, 1], [], []>} : vector<64x64xbf16>, vector<64x256xbf16>, vector<64x256xf32> -> vector<64x256xf32>
    %c0_26 = arith.constant 0 : index
    %c0_27 = arith.constant 0 : index
    %88 = vector.load %arg9[%c0_26, %c0_27] : memref<1x256xf32, #tpu.memory_space<vmem>>, vector<1x256xf32>
    %89 = vector.broadcast %88 : vector<1x256xf32> to vector<64x256xf32>
    %90 = arith.addf %87, %89 : vector<64x256xf32>
    %91 = arith.extf %44 : vector<64x256xbf16> to vector<64x256xf32>
    %92 = arith.addf %90, %91 : vector<64x256xf32>
    %cst_28 = arith.constant 0.000000e+00 : f32
    %93 = vector.broadcast %cst_28 : f32 to vector<64x256xf32>
    %94 = arith.maximumf %92, %93 : vector<64x256xf32>
    %95 = vector.shape_cast %94 : vector<64x256xf32> to vector<1x64x256xf32>
    %cst_29 = arith.constant dense<0.000000e+00> : vector<1x256xf32>
    %96 = vector.multi_reduction <add>, %95, %cst_29 [1] : vector<1x64x256xf32> to vector<1x256xf32>
    %cst_30 = arith.constant 6.400000e+01 : f32
    %97 = vector.broadcast %cst_30 : f32 to vector<1x256xf32>
    %98 = arith.divf %96, %97 : vector<1x256xf32>
    %cst_31 = arith.constant 0.000000e+00 : f32
    %99 = vector.broadcast %cst_31 : f32 to vector<7x256xf32>
    %100 = tpu.concatenate %98, %99 in 0 : vector<1x256xf32>, vector<7x256xf32> -> vector<8x256xf32>
    %101 = arith.truncf %100 : vector<8x256xf32> to vector<8x256xbf16>
    %c0_32 = arith.constant 0 : index
    %c0_33 = arith.constant 0 : index
    %102 = vector.load %arg10[%c0_32, %c0_33] : memref<256x64xbf16, #tpu.memory_space<vmem>>, vector<256x64xbf16>
    %cst_34 = arith.constant dense<0.000000e+00> : vector<8x64xf32>
    %103 = tpu.matmul %101, %102, %cst_34 {dimension_numbers = #tpu.dot_dimension_numbers<[1], [0], [0], [1], [0, 0, 1, 1], [], []>} : vector<8x256xbf16>, vector<256x64xbf16>, vector<8x64xf32> -> vector<8x64xf32>
    %c0_35 = arith.constant 0 : index
    %c0_36 = arith.constant 0 : index
    %104 = vector.load %arg11[%c0_35, %c0_36] : memref<1x64xf32, #tpu.memory_space<vmem>>, vector<1x64xf32>
    %105 = vector.broadcast %104 : vector<1x64xf32> to vector<8x64xf32>
    %106 = arith.addf %103, %105 : vector<8x64xf32>
    %cst_37 = arith.constant 0.000000e+00 : f32
    %107 = vector.broadcast %cst_37 : f32 to vector<8x64xf32>
    %108 = arith.maximumf %106, %107 : vector<8x64xf32>
    %109 = arith.truncf %108 : vector<8x64xf32> to vector<8x64xbf16>
    %c0_38 = arith.constant 0 : index
    %c0_39 = arith.constant 0 : index
    %110 = vector.load %arg12[%c0_38, %c0_39] : memref<64x10xbf16, #tpu.memory_space<vmem>>, vector<64x10xbf16>
    %cst_40 = arith.constant dense<0.000000e+00> : vector<8x10xf32>
    %111 = tpu.matmul %109, %110, %cst_40 {dimension_numbers = #tpu.dot_dimension_numbers<[1], [0], [0], [1], [0, 0, 1, 1], [], []>} : vector<8x64xbf16>, vector<64x10xbf16>, vector<8x10xf32> -> vector<8x10xf32>
    %c0_41 = arith.constant 0 : index
    %c0_42 = arith.constant 0 : index
    %112 = vector.load %arg13[%c0_41, %c0_42] : memref<1x10xf32, #tpu.memory_space<vmem>>, vector<1x10xf32>
    %113 = vector.broadcast %112 : vector<1x10xf32> to vector<8x10xf32>
    %114 = arith.addf %111, %113 : vector<8x10xf32>
    %115 = vector.extract_strided_slice %114 {offsets = [0, 0], sizes = [1, 10], strides = [1, 1]} : vector<8x10xf32> to vector<1x10xf32>
    %c0_43 = arith.constant 0 : index
    %c0_44 = arith.constant 0 : index
    %c0_45 = arith.constant 0 : index
    %116 = vector.load %arg14[%c0_43, %c0_44, %c0_45] : memref<1x1x10xf32, #tpu.memory_space<vmem>>, vector<1x1x10xf32>
    %117 = vector.shape_cast %116 : vector<1x1x10xf32> to vector<1x10xf32>
    %118 = vector.shape_cast %115 : vector<1x10xf32> to vector<1x1x10xf32>
    tpu.vector_store %arg14[%c0_43, %c0_44, %c0_45], %118 {strides = array<i32>} : memref<1x1x10xf32, #tpu.memory_space<vmem>>, vector<1x1x10xf32>,
    return
  }
  func.func @transform_0(%arg0: i32) -> (i32, i32, i32) {
    %c0_i32 = arith.constant 0 : i32
    %c0_i32_0 = arith.constant 0 : i32
    %c0_i32_1 = arith.constant 0 : i32
    return %arg0, %c0_i32, %c0_i32_0 : i32, i32, i32
  }
  func.func @transform_1(%arg0: i32) -> (i32, i32) {
    %c0_i32 = arith.constant 0 : i32
    %c0_i32_0 = arith.constant 0 : i32
    %c0_i32_1 = arith.constant 0 : i32
    return %c0_i32, %c0_i32_0 : i32, i32
  }
  func.func @transform_2(%arg0: i32) -> (i32, i32) {
    %c0_i32 = arith.constant 0 : i32
    %c0_i32_0 = arith.constant 0 : i32
    %c0_i32_1 = arith.constant 0 : i32
    return %c0_i32, %c0_i32_0 : i32, i32
  }
  func.func @transform_3(%arg0: i32) -> (i32, i32) {
    %c0_i32 = arith.constant 0 : i32
    %c0_i32_0 = arith.constant 0 : i32
    %c0_i32_1 = arith.constant 0 : i32
    return %c0_i32, %c0_i32_0 : i32, i32
  }
  func.func @transform_4(%arg0: i32) -> (i32, i32) {
    %c0_i32 = arith.constant 0 : i32
    %c0_i32_0 = arith.constant 0 : i32
    %c0_i32_1 = arith.constant 0 : i32
    return %c0_i32, %c0_i32_0 : i32, i32
  }
  func.func @transform_5(%arg0: i32) -> (i32, i32) {
    %c0_i32 = arith.constant 0 : i32
    %c0_i32_0 = arith.constant 0 : i32
    %c0_i32_1 = arith.constant 0 : i32
    return %c0_i32, %c0_i32_0 : i32, i32
  }
  func.func @transform_6(%arg0: i32) -> (i32, i32) {
    %c0_i32 = arith.constant 0 : i32
    %c0_i32_0 = arith.constant 0 : i32
    %c0_i32_1 = arith.constant 0 : i32
    return %c0_i32, %c0_i32_0 : i32, i32
  }
  func.func @transform_7(%arg0: i32) -> (i32, i32) {
    %c0_i32 = arith.constant 0 : i32
    %c0_i32_0 = arith.constant 0 : i32
    %c0_i32_1 = arith.constant 0 : i32
    return %c0_i32, %c0_i32_0 : i32, i32
  }
  func.func @transform_8(%arg0: i32) -> (i32, i32) {
    %c0_i32 = arith.constant 0 : i32
    %c0_i32_0 = arith.constant 0 : i32
    %c0_i32_1 = arith.constant 0 : i32
    return %c0_i32, %c0_i32_0 : i32, i32
  }
  func.func @transform_9(%arg0: i32) -> (i32, i32) {
    %c0_i32 = arith.constant 0 : i32
    %c0_i32_0 = arith.constant 0 : i32
    %c0_i32_1 = arith.constant 0 : i32
    return %c0_i32, %c0_i32_0 : i32, i32
  }
  func.func @transform_10(%arg0: i32) -> (i32, i32) {
    %c0_i32 = arith.constant 0 : i32
    %c0_i32_0 = arith.constant 0 : i32
    %c0_i32_1 = arith.constant 0 : i32
    return %c0_i32, %c0_i32_0 : i32, i32
  }
  func.func @transform_11(%arg0: i32) -> (i32, i32) {
    %c0_i32 = arith.constant 0 : i32
    %c0_i32_0 = arith.constant 0 : i32
    %c0_i32_1 = arith.constant 0 : i32
    return %c0_i32, %c0_i32_0 : i32, i32
  }
  func.func @transform_12(%arg0: i32) -> (i32, i32) {
    %c0_i32 = arith.constant 0 : i32
    %c0_i32_0 = arith.constant 0 : i32
    %c0_i32_1 = arith.constant 0 : i32
    return %c0_i32, %c0_i32_0 : i32, i32
  }
  func.func @transform_13(%arg0: i32) -> (i32, i32, i32) {
    %c0_i32 = arith.constant 0 : i32
    %c0_i32_0 = arith.constant 0 : i32
    %c0_i32_1 = arith.constant 0 : i32
    return %arg0, %c0_i32, %c0_i32_0 : i32, i32, i32
  }
}

</mosaic_0001>

<bundles_post_ra>
// kernel: resnet_classifier_forward.1
= control target key start
LH: loop header
LB: loop body
LE: loop exit
PB: predicated region body
PF: predicated region fallthrough
CT: control target
= control target key end

     0   :  { %18 = vsyncpa [#allocation3], 0  ;;  %s5025_s0 = inlined_call_operand.vmem [shape: bf16[2,256,256], index: 0, kind: input, shape index: {}]   ;;  %s5026_s1 = inlined_call_operand.vmem [shape: bf16[256,64], index: 1, kind: input, shape index: {}]   ;;  %s5027_s2 = inlined_call_operand.vmem [shape: f32[1,64], index: 2, kind: input, shape index: {}]   ;;  %s5028_s3 = inlined_call_operand.vmem [shape: bf16[64,320], index: 3, kind: input, shape index: {}]   ;;  %s5029_s4 = inlined_call_operand.vmem [shape: f32[1,320], index: 4, kind: input, shape index: {}]   ;;  %s5030_s5 = inlined_call_operand.vmem [shape: bf16[576,64], index: 5, kind: input, shape index: {}]   ;;  %s5031_s6 = inlined_call_operand.vmem [shape: f32[1,64], index: 6, kind: input, shape index: {}]   ;;  %s5032_s7 = inlined_call_operand.vmem [shape: bf16[64,256], index: 7, kind: input, shape index: {}]   ;;  %s5033_s8 = inlined_call_operand.vmem [shape: f32[1,256], index: 8, kind: input, shape index: {}]   ;;  %s5034_s9 = inlined_call_operand.vmem [shape: bf16[256,64], index: 9, kind: input, shape index: {}]   ;;  %s5035_s10 = inlined_call_operand.vmem [shape: f32[1,64], index: 10, kind: input, shape index: {}]   ;;  %s5036_s11 = inlined_call_operand.vmem [shape: bf16[64,10], index: 11, kind: input, shape index: {}]   ;;  %s5037_s12 = inlined_call_operand.vmem [shape: f32[1,10], index: 12, kind: input, shape index: {}]   ;;  %s5038_s13 = inlined_call_operand.hbm [shape: f32[2,1,10], index: 13, kind: output, shape index: {}]  }
   0x1   :  { %20 = vsyncpa [#allocation3 + $0x1], 0  ;;  %s3866_s25 = smov 0   ;;  %s3868_s26 = smov 0  }
   0x2   :  { %s3870_s27 = smov 0   ;;  %s3872_s28 = smov 0  }
   0x3 LB: > { %5044 = sst [smem:[#allocation5_spill]] %s3778_s25  ;;  %s3887_s29 = sadd.s32 4294967295, %s3790_s28   ;;  %s3790_s28 = sphi %s3872_s28, %s5053_s28   ;;  %s3786_s27 = sphi %s3870_s27, %s5055_s27   ;;  %s3782_s26 = sphi %s3868_s26, %s5057_s26   ;;  %s3778_s25 = sphi %s3866_s25, %s5056_s25  }
   0x4   : > { %5045 = sst [smem:[#allocation6_spill]] %s3786_s27  ;;  %s3018_s30 = sadd.s32 4294967294, %s3790_s28  }
   0x5   : > { %s3891_s14 = sadd.s32 1, %s3790_s28   ;;  %s311_s15 = sadd.s32 1, %s3786_s27 }
   0x6   : > { %5046 = sst [smem:[#allocation7_spill]] %s3891_s14  ;;  %s308_s16 = ssub.s32 %s3790_s28, %s3891_s14 }
   0x7   : > { %p321_p0 = scmp.ne.s32.totalorder %s3786_s27, %s3782_s26  ;;  %p309_p1 = scmp.eq.s32.totalorder %s308_s16, 0 }
   0x8   : > { %p322_p2 = scmp.eq.s32.totalorder %s3887_s29, 1  ;;  %p327_p3 = scmp.ne.s32.totalorder %s3782_s26, %s3778_s25 }
   0x9   : > { %p328_p4 = scmp.eq.s32.totalorder %s3018_s30, 1  ;;  %p3021_p7 = scmp.ge.s32.totalorder %s3790_s28, 1 }
   0xa   : > { %s3902_s17 = scalar_select %p309_p1, %s3786_s27, %s311_s15  }
   0xb   : > { %p3904_p5 = por %p322_p2, %p321_p0  ;;  %p3908_p6 = por %p328_p4, %p327_p3 }
   0xc   : > { %5047 = sst [smem:[#allocation8_spill]] %s3902_s17  ;;  %p390_p8 = scmp.lt.s32.totalorder %s3790_s28, 3 }
   0xd   : > { %s5049_s19 = scalar_select %p3908_p6, 1, 0 }
   0xe   : > { %p391_p9 = pnand %p3021_p7, %p390_p8 }
   0xf   : > { %5050 = sst [smem:[#allocation9_spill]] %s5049_s19  ;;  %p433_p10 = scmp.lt.s32.totalorder (!%p391_p9), %s3887_s29, 1 }
  0x10   : > { %394 = sbr.rel (%p391_p9) target bundleno = 1485 (0x5cd), region = 72  ;;  %s431_s25 = sand.u32 (!%p391_p9), 1, %s3782_s26  }
  0x11   : > { %s2959_s24 = scalar_lea.hbm (!%p391_p9), %s5038_s13, %s3887_s29  ;;  %s2951_s23 = scalar_lea.sflag (!%p391_p9), [#allocation3], %s431_s25 }
  0x12   : > { %s2963_s17 = sshll.u32 (!%p391_p9), %s2959_s24, 4  ;;  %s3748_s14 = scalar_lea.hbm (!%p391_p9), %s5038_s13, 2  ;;  %s2964_s17 = int_to_ptr.hbm [resolvable:$true] %s2963_s17 }
  0x15   : > { %v3593_v0 = vld [vmem:[%s5026_s1 + $0x38] sm:$0xff]  ;;  %v3592_v2 = vld [vmem:[%s5026_s1 + $0x30] sm:$0xff]  ;;  %v3591_v4 = vld [vmem:[%s5026_s1 + $0x28] sm:$0xff]  ;;  %s434_s21 = scalar_select %p433_p10, %s3887_s29, 1  ;;  %vm1005_vm0 = vcmask 1040384   ;;  %vm1102_vm1 = vcmask 1046528  }
  0x16   : > { %v3601_v1 = vld [vmem:[%s5026_s1 + $0x78] sm:$0xff]  ;;  %763 = vmatpush.bf16.msra.mxu0 %v3593_v0  ;;  %v3600_v3 = vld [vmem:[%s5026_s1 + $0x70] sm:$0xff]  ;;  %v3599_v5 = vld [vmem:[%s5026_s1 + $0x68] sm:$0xff]  ;;  %vm1431_vm2 = vcmask 1041408   ;;  %vm1440_vm3 = vcmask 1042432   ;;  %vm1449_vm4 = vcmask 1043456  }
  0x17   : > { %852 = vmatpush.bf16.msra.mxu1 %v3601_v1  ;;  %v3590_v6 = vld [vmem:[%s5026_s1 + $0x20] sm:$0xff]  ;;  %v3589_v8 = vld [vmem:[%s5026_s1 + $0x18] sm:$0xff]  ;;  %v3588_v10 = vld [vmem:[%s5026_s1 + $0x10] sm:$0xff]  ;;  %s3553_s30 = sshll.u32 %s434_s21, 8  ;;  %vm1458_vm5 = vcmask 1044480   ;;  %vm1467_vm6 = vcmask 1045504  }
  0x18   : > { %v3598_v7 = vld [vmem:[%s5026_s1 + $0x60] sm:$0xff]  ;;  %v3597_v9 = vld [vmem:[%s5026_s1 + $0x58] sm:$0xff]  ;;  %v3596_v11 = vld [vmem:[%s5026_s1 + $0x50] sm:$0xff]  ;;  %s3961_s22 = scalar_lea.vmem %s5025_s0, %s3553_s30  ;;  %vm1576_vm7 = vcmask 523264   ;;  %s3793_s30 = smov 64   ;;  %vm2948_vm10 = vcmask 73728  }
  0x19   : > { %v3587_v12 = vld [vmem:[%s5026_s1 + $0x8] sm:$0xff]  ;;  %v3586_v14 = vld [vmem:[%s5026_s1] sm:$0xff]  ;;  %v3034_v22 = vld [vmem:[%s3961_s22 + $0x10] sm:$0xf] }
  0x1a   : > { %764 = vmatpush.bf16.msra.mxu0 %v3592_v2  ;;  %v3595_v13 = vld [vmem:[%s5026_s1 + $0x48] sm:$0xff]  ;;  %v3594_v15 = vld [vmem:[%s5026_s1 + $0x40] sm:$0xff]  ;;  %v3557_v23 = vld [vmem:[%s3961_s22 + $0x14] sm:$0xf0] }
  0x1b   : > { %853 = vmatpush.bf16.msra.mxu1 %v3600_v3  ;;  %v3026_v16 = vld [vmem:[%s3961_s22] sm:$0xf]  ;;  %v3555_v17 = vld [vmem:[%s3961_s22 + $0x4] sm:$0xf0]  ;;  %v3554_v18 = vld [vmem:[%s3961_s22 + $0x4] sm:$0xf]  ;;  %v3035_v26 = vor.u32 %v3557_v23, %v3034_v22 }
  0x1c   : > { %v3028_v19 = vld [vmem:[%s3961_s22 + $0x8] sm:$0xf0]  ;;  %v3027_v20 = vor.u32 %v3555_v17, %v3026_v16  ;;  %v3556_v24 = vld [vmem:[%s3961_s22 + $0x14] sm:$0xf]  ;;  %v3036_v25 = vld [vmem:[%s3961_s22 + $0x18] sm:$0xf0] }
  0x1d   : > { %v3031_v21 = vor.u32 %v3554_v18, %v3028_v19  ;;  %v3039_v27 = vor.u32 %v3556_v24, %v3036_v25  ;;  %v3042_v28 = vld [vmem:[%s3961_s22 + $0x20] sm:$0xf]  ;;  %v3559_v29 = vld [vmem:[%s3961_s22 + $0x24] sm:$0xf0]  ;;  %v3558_v30 = vld [vmem:[%s3961_s22 + $0x24] sm:$0xf] }
  0x1e   : > { %765 = vmatpush.bf16.msra.mxu0 %v3591_v4  ;;  %v3044_v31 = vld [vmem:[%s3961_s22 + $0x28] sm:$0xf0]  ;;  %v3043_v32 = vor.u32 %v3559_v29, %v3042_v28  ;;  %v3050_v34 = vld [vmem:[%s3961_s22 + $0x30] sm:$0xf]  ;;  %v3561_v35 = vld [vmem:[%s3961_s22 + $0x34] sm:$0xf0] }
  0x1f   : > { %854 = vmatpush.bf16.msra.mxu1 %v3599_v5  ;;  %v3047_v33 = vor.u32 %v3558_v30, %v3044_v31  ;;  %v3560_v36 = vld [vmem:[%s3961_s22 + $0x34] sm:$0xf]  ;;  %v3052_v37 = vld [vmem:[%s3961_s22 + $0x38] sm:$0xf0]  ;;  %v3051_v38 = vor.u32 %v3561_v35, %v3050_v34  ;;  %v3058_v40 = vld [vmem:[%s3961_s22 + $0x40] sm:$0xf] }
  0x20   : > { %v3055_v39 = vor.u32 %v3560_v36, %v3052_v37  ;;  %v3563_v41 = vld [vmem:[%s3961_s22 + $0x44] sm:$0xf0]  ;;  %v3562_v42 = vld [vmem:[%s3961_s22 + $0x44] sm:$0xf]  ;;  %v3060_v43 = vld [vmem:[%s3961_s22 + $0x48] sm:$0xf0] }
  0x21   : > { %v3059_v44 = vor.u32 %v3563_v41, %v3058_v40  ;;  %v3063_v45 = vor.u32 %v3562_v42, %v3060_v43  ;;  %v3066_v46 = vld [vmem:[%s3961_s22 + $0x50] sm:$0xf]  ;;  %v3565_v47 = vld [vmem:[%s3961_s22 + $0x54] sm:$0xf0]  ;;  %v3564_v48 = vld [vmem:[%s3961_s22 + $0x54] sm:$0xf] }
  0x22   : > { %766 = vmatpush.bf16.msra.mxu0 %v3590_v6  ;;  %v3068_v49 = vld [vmem:[%s3961_s22 + $0x58] sm:$0xf0]  ;;  %v3067_v50 = vor.u32 %v3565_v47, %v3066_v46  ;;  %v3074_v52 = vld [vmem:[%s3961_s22 + $0x60] sm:$0xf]  ;;  %v3567_v53 = vld [vmem:[%s3961_s22 + $0x64] sm:$0xf0] }
  0x23   : > { %855 = vmatpush.bf16.msra.mxu1 %v3598_v7  ;;  %v3071_v51 = vor.u32 %v3564_v48, %v3068_v49  ;;  %v3566_v54 = vld [vmem:[%s3961_s22 + $0x64] sm:$0xf]  ;;  %v3076_v55 = vld [vmem:[%s3961_s22 + $0x68] sm:$0xf0]  ;;  %v3075_v56 = vor.u32 %v3567_v53, %v3074_v52  ;;  %v3082_v58 = vld [vmem:[%s3961_s22 + $0x70] sm:$0xf] }
  0x24   : > { %v3079_v57 = vor.u32 %v3566_v54, %v3076_v55  ;;  %v3569_v59 = vld [vmem:[%s3961_s22 + $0x74] sm:$0xf0]  ;;  %v3568_v60 = vld [vmem:[%s3961_s22 + $0x74] sm:$0xf]  ;;  %v3084_v61 = vld [vmem:[%s3961_s22 + $0x78] sm:$0xf0] }
  0x25   : > { %v3083_v62 = vor.u32 %v3569_v59, %v3082_v58  ;;  %v3087_v63 = vor.u32 %v3568_v60, %v3084_v61  ;;  %v3090_v0 = vld [vmem:[%s3961_s22 + $0x80] sm:$0xf]  ;;  %v3571_v1 = vld [vmem:[%s3961_s22 + $0x84] sm:$0xf0]  ;;  %v3570_v2 = vld [vmem:[%s3961_s22 + $0x84] sm:$0xf] }
  0x26   : > { %767 = vmatpush.bf16.msra.mxu0 %v3589_v8  ;;  %v3092_v3 = vld [vmem:[%s3961_s22 + $0x88] sm:$0xf0]  ;;  %v3091_v4 = vor.u32 %v3571_v1, %v3090_v0  ;;  %v3106_v22 = vld [vmem:[%s3961_s22 + $0xa0] sm:$0xf]  ;;  %v3575_v23 = vld [vmem:[%s3961_s22 + $0xa4] sm:$0xf0] }
  0x27   : > { %856 = vmatpush.bf16.msra.mxu1 %v3597_v9  ;;  %v3095_v5 = vor.u32 %v3570_v2, %v3092_v3  ;;  %v3574_v24 = vld [vmem:[%s3961_s22 + $0xa4] sm:$0xf]  ;;  %v3108_v25 = vld [vmem:[%s3961_s22 + $0xa8] sm:$0xf0]  ;;  %v3107_v30 = vor.u32 %v3575_v23, %v3106_v22  ;;  %v3254_v36 = vld [vmem:[%s5028_s3 + $0x48] sm:$0xf] }
  0x28   : > { %v3111_v31 = vor.u32 %v3574_v24, %v3108_v25  ;;  %v3256_v40 = vld [vmem:[%s5028_s3 + $0x54] sm:$0xf0]  ;;  %v3242_v46 = vld [vmem:[%s5028_s3 + $0x30] sm:$0xf]  ;;  %v3609_v47 = vld [vmem:[%s5028_s3 + $0x38] sm:$0xf0] }
  0x29   : > { %v3243_v49 = vor.u32 %v3609_v47, %v3242_v46  ;;  %v3230_v58 = vld [vmem:[%s5028_s3 + $0x18] sm:$0xf]  ;;  %v3606_v59 = vld [vmem:[%s5028_s3 + $0x20] sm:$0xf0]  ;;  %v3114_v2 = vld [vmem:[%s3961_s22 + $0xb0] sm:$0xf] }
  0x2a   : > { %768 = vmatpush.bf16.msra.mxu0 %v3588_v10  ;;  %v3098_v10 = vld [vmem:[%s3961_s22 + $0x90] sm:$0xf]  ;;  %v3231_v61 = vor.u32 %v3606_v59, %v3230_v58  ;;  %v3577_v3 = vld [vmem:[%s3961_s22 + $0xb4] sm:$0xf0]  ;;  %v3578_v58 = vld [vmem:[%s3961_s22 + $0xc4] sm:$0xf] }
  0x2b   : > { %857 = vmatpush.bf16.msra.mxu1 %v3596_v11  ;;  %v3573_v11 = vld [vmem:[%s3961_s22 + $0x94] sm:$0xf0]  ;;  %v3115_v22 = vor.u32 %v3577_v3, %v3114_v2  ;;  %v3124_v59 = vld [vmem:[%s3961_s22 + $0xc8] sm:$0xf0]  ;;  %vm3528_vm9 = vmpackc.low %vm1005_vm0, %vm1005_vm0 }
  0x2c   : > { %v3127_v3 = vor.u32 %v3578_v58, %v3124_v59 }
  0x2e   : > { %769 = vmatpush.bf16.msra.mxu0 %v3587_v12  ;;  %v3572_v12 = vld [vmem:[%s3961_s22 + $0x94] sm:$0xf] }
  0x2f   : > { %858 = vmatpush.bf16.msra.mxu1 %v3595_v13  ;;  %v3100_v13 = vld [vmem:[%s3961_s22 + $0x98] sm:$0xf0] }
  0x32   : > { %770 = vmatpush.bf16.msra.mxu0 %v3586_v14  ;;  %v3099_v14 = vor.u32 %v3573_v11, %v3098_v10 }
  0x33   : > { %859 = vmatpush.bf16.msra.mxu1 %v3594_v15  ;;  %v3103_v15 = vor.u32 %v3572_v12, %v3100_v13  ;;  %v3218_v13 = vld [vmem:[%s5028_s3] sm:$0xf] }
  0x35   : > { %771 = vmatmul.bf16.vlgmr.msra.gmra.mxu0 %v3027_v20  ;;  %v4012_v20 = vld [vmem:[%s5027_s2] ss:$0 sm:$0xff] }
  0x36   : > { %860 = vmatmul.bf16.vlgmr.msra.gmra.mxu1 %v3031_v21 }
  0x45   : > { %776 = vmatmul.bf16.gmra.mxu0 %v3035_v26 }
  0x46   : > { %865 = vmatmul.bf16.gmra.mxu1 %v3039_v27 }
  0x55   : > { %781 = vmatmul.bf16.gmra.mxu0 %v3043_v32 }
  0x56   : > { %870 = vmatmul.bf16.gmra.mxu1 %v3047_v33 }
  0x65   : > { %786 = vmatmul.bf16.gmra.mxu0 %v3051_v38  ;;  %v3612_v38 = vld [vmem:[%s5028_s3 + $0x50] sm:$0xf0] }
  0x66   : > { %875 = vmatmul.bf16.gmra.mxu1 %v3055_v39  ;;  %v3611_v39 = vld [vmem:[%s5028_s3 + $0x4c] sm:$0xf]  ;;  %v3255_v42 = vor.u32 %v3612_v38, %v3254_v36 }
  0x67   : > { %v3259_v43 = vor.u32 %v3611_v39, %v3256_v40 }
  0x68   : > { %1593 = vmatpush.bf16.msra.mxu2 %v3255_v42 }
  0x69   : > { %1622 = vmatpush.bf16.msra.mxu3 %v3259_v43 }
  0x6c   : > { %1594 = vmatpush.bf16.msra.mxu2 %v3243_v49 }
  0x70   : > { %1595 = vmatpush.bf16.msra.mxu2 %v3231_v61 }
  0x75   : > { %791 = vmatmul.bf16.gmra.mxu0 %v3059_v44 }
  0x76   : > { %880 = vmatmul.bf16.gmra.mxu1 %v3063_v45 }
  0x85   : > { %796 = vmatmul.bf16.gmra.mxu0 %v3067_v50  ;;  %v3608_v50 = vld [vmem:[%s5028_s3 + $0x34] sm:$0xf] }
  0x86   : > { %885 = vmatmul.bf16.gmra.mxu1 %v3071_v51  ;;  %v3244_v51 = vld [vmem:[%s5028_s3 + $0x3c] sm:$0xf0] }
  0x87   : > { %v3247_v53 = vor.u32 %v3608_v50, %v3244_v51 }
  0x89   : > { %1623 = vmatpush.bf16.msra.mxu3 %v3247_v53 }
  0x95   : > { %801 = vmatmul.bf16.gmra.mxu0 %v3075_v56 }
  0x96   : > { %890 = vmatmul.bf16.gmra.mxu1 %v3079_v57 }
  0xa5   : > { %806 = vmatmul.bf16.gmra.mxu0 %v3083_v62  ;;  %v3605_v62 = vld [vmem:[%s5028_s3 + $0x1c] sm:$0xf] }
  0xa6   : > { %895 = vmatmul.bf16.gmra.mxu1 %v3087_v63  ;;  %v3232_v63 = vld [vmem:[%s5028_s3 + $0x24] sm:$0xf0] }
  0xb2   : > { %v772_v6 = vpop.f32.mrf.mxu0 }
  0xb3   : > { %v861_v7 = vpop.f32.mrf.mxu1  ;;  %v773_v26 = vadd.f32 %v4012_v20, %v772_v6 }
  0xb5   : > { %811 = vmatmul.bf16.gmra.mxu0 %v3091_v4  ;;  %v862_v34 = vadd.f32 %v861_v7, %v773_v26  ;;  %v3235_v4 = vor.u32 %v3605_v62, %v3232_v63  ;;  %v3576_v7 = vld [vmem:[%s3961_s22 + $0xb4] sm:$0xf] }
  0xb6   : > { %900 = vmatmul.bf16.gmra.mxu1 %v3095_v5 }
  0xb7   : > { %v4036_v44 = vmax.f32 %v862_v34, 0.0  ;;  %1624 = vmatpush.bf16.msra.mxu3 %v3235_v4 }
  0xb9   : > { %v1006_v56 = vrot.slane %v4036_v44, 7  ;;  %v1103_v5 = vrot.slane %v4036_v44, 1 }
  0xba   : > { %v774_v8 = vpop.f32.mrf.mxu0 }
  0xbb   : > { %v863_v9 = vpop.f32.mrf.mxu1  ;;  %v775_v28 = vadd.f32 %v4012_v20, %v774_v8  ;;  %v3116_v8 = vld [vmem:[%s3961_s22 + $0xb8] sm:$0xf0] }
  0xbc   : > { %v3119_v23 = vor.u32 %v3576_v7, %v3116_v8 }
  0xbd   : > { %v864_v37 = vadd.f32 %v863_v9, %v775_v28  ;;  %v1086_v9 = vsel %vm1005_vm0, 0.0, %v1006_v56 }
  0xbe   : > { %v1199_v25 = vmax.f32 %v4036_v44, %v1086_v9 }
  0xbf   : > { %v4046_v48 = vmax.f32 %v864_v37, 0.0 }
  0xc1   : > { %v1104_v60 = vrot.slane %v4046_v48, 1 }
  0xc2   : > { %v777_v16 = vpop.f32.mrf.mxu0 }
  0xc3   : > { %v866_v17 = vpop.f32.mrf.mxu1  ;;  %v778_v21 = vadd.f32 %v4012_v20, %v777_v16  ;;  %v1183_v43 = vsel %vm1102_vm1, %v1104_v60, 0.0 }
  0xc5   : > { %816 = vmatmul.bf16.gmra.mxu0 %v3099_v14  ;;  %v867_v29 = vadd.f32 %v866_v17, %v778_v21  ;;  %v3603_v14 = vld [vmem:[%s5028_s3 + $0x8] sm:$0xf0]  ;;  %v1105_v21 = vsel %vm1102_vm1, %v1103_v5, %v1104_v60 }
  0xc6   : > { %905 = vmatmul.bf16.gmra.mxu1 %v3103_v15  ;;  %v1007_v15 = vrot.slane %v4046_v48, 7  ;;  %v3219_v17 = vor.u32 %v3603_v14, %v3218_v13  ;;  %v1231_v34 = vmax.f32 %v1199_v25, %v1105_v21 }
  0xc7   : > { %v943_v41 = vmax.f32 %v867_v29, 0.0 }
  0xc8   : > { %1596 = vmatpush.bf16.msra.mxu2 %v3219_v17 }
  0xc9   : > { %v1009_v52 = vrot.slane %v943_v41, 7  ;;  %v1106_v1 = vrot.slane %v943_v41, 1 }
  0xca   : > { %v779_v18 = vpop.f32.mrf.mxu0 }
  0xcb   : > { %v868_v19 = vpop.f32.mrf.mxu1  ;;  %v780_v27 = vadd.f32 %v4012_v20, %v779_v18  ;;  %v1087_v0 = vsel %vm1005_vm0, 0.0, %v1009_v52  ;;  %v3602_v18 = vld [vmem:[%s5028_s3 + $0x4] sm:$0xf] }
  0xcc   : > { %v1201_v16 = vmax.f32 %v943_v41, %v1087_v0 }
  0xcd   : > { %v869_v35 = vadd.f32 %v868_v19, %v780_v27  ;;  %v3220_v19 = vld [vmem:[%s5028_s3 + $0xc] sm:$0xf0] }
  0xce   : > { %v3223_v24 = vor.u32 %v3602_v18, %v3220_v19 }
  0xcf   : > { %v4038_v45 = vmax.f32 %v869_v35, 0.0  ;;  %v1008_v35 = vsel %vm1005_vm0, %v1006_v56, %v1007_v15 }
  0xd0   : > { %1625 = vmatpush.bf16.msra.mxu3 %v3223_v24  ;;  %v1200_v41 = vmax.f32 %v4046_v48, %v1008_v35 }
  0xd1   : > { %v1107_v57 = vrot.slane %v4038_v45, 1  ;;  %v1010_v6 = vrot.slane %v4038_v45, 7 }
  0xd2   : > { %v782_v32 = vpop.f32.mrf.mxu0  ;;  %v1232_v53 = vmax.f32 %v1200_v41, %v1183_v43 }
  0xd3   : > { %v4022_v33 = vpop.f32.mrf.mxu1  ;;  %v1108_v10 = vsel %vm1102_vm1, %v1106_v1, %v1107_v57  ;;  %v783_v11 = vadd.f32 %v4012_v20, %v782_v32  ;;  %v1011_v26 = vsel %vm1005_vm0, %v1009_v52, %v1010_v6  ;;  %v1184_v42 = vsel %vm1102_vm1, %v1107_v57, 0.0 }
  0xd4   : > { %v4096_v27 = vmax.f32 %v1201_v16, %v1108_v10  ;;  %v1202_v37 = vmax.f32 %v4038_v45, %v1011_v26 }
  0xd5   : > { %821 = vmatmul.bf16.gmra.mxu0 %v3107_v30  ;;  %v872_v30 = vadd.f32 %v4022_v33, %v783_v11 }
  0xd6   : > { %910 = vmatmul.bf16.gmra.mxu1 %v3111_v31  ;;  %v1263_v38 = vmax.f32 %v1231_v34, %v4096_v27  ;;  %v1234_v44 = vmax.f32 %v1202_v37, %v1184_v42  ;;  %v3130_v42 = vld [vmem:[%s3961_s22 + $0xd0] sm:$0xf] }
  0xd7   : > { %v945_v39 = vmax.f32 %v872_v30, 0.0 }
  0xd8   : > { %v1279_v46 = vmax.f32 %v1263_v38, 0.0  ;;  %v1264_v57 = vmax.f32 %v1232_v53, %v1234_v44 }
  0xd9   : > { %v1012_v45 = vrot.slane %v945_v39, 7  ;;  %v1109_v62 = vrot.slane %v945_v39, 1 }
  0xda   : > { %v784_v54 = vpop.f32.mrf.mxu0  ;;  %v1303_v61 = vrot.slane %v1279_v46, 1  ;;  %v1319_v4 = vrot.slane %v1279_v46, 2  ;;  %v1280_v15 = vmax.f32 %v1264_v57, 0.0 }
  0xdb   : > { %v873_v55 = vpop.f32.mrf.mxu1  ;;  %v785_v12 = vadd.f32 %v4012_v20, %v784_v54  ;;  %v3122_v54 = vld [vmem:[%s3961_s22 + $0xc0] sm:$0xf]  ;;  %v1088_v60 = vsel %vm1005_vm0, 0.0, %v1012_v45 }
  0xdc   : > { %v1203_v9 = vmax.f32 %v945_v39, %v1088_v60  ;;  %v1423_v14 = vsel %vm1005_vm0, %v1279_v46, %v1303_v61  ;;  %v1359_v30 = vrot.slane %v1280_v15, 4  ;;  %v1375_v41 = vrot.slane %v1280_v15, 5 }
  0xdd   : > { %v874_v31 = vadd.f32 %v873_v55, %v785_v12  ;;  %v3579_v55 = vld [vmem:[%s3961_s22 + $0xc4] sm:$0xf0]  ;;  %v1432_v24 = vsel %vm1431_vm2, %v1423_v14, %v1319_v4  ;;  %v1407_v60 = vrot.slane %v1280_v15, 7 }
  0xde   : > { %v3123_v2 = vor.u32 %v3579_v55, %v3122_v54 }
  0xdf   : > { %v946_v40 = vmax.f32 %v874_v31, 0.0 }
  0xe1   : > { %v1013_v50 = vrot.slane %v946_v40, 7  ;;  %v1110_v56 = vrot.slane %v946_v40, 1 }
  0xe2   : > { %v787_v28 = vpop.f32.mrf.mxu0 }
  0xe3   : > { %v876_v29 = vpop.f32.mrf.mxu1  ;;  %v788_v32 = vadd.f32 %v4012_v20, %v787_v28  ;;  %v1014_v63 = vsel %vm1005_vm0, %v1012_v45, %v1013_v50  ;;  %v1111_v5 = vsel %vm1102_vm1, %v1109_v62, %v1110_v56  ;;  %v3132_v45 = vld [vmem:[%s3961_s22 + $0xd8] sm:$0xf0] }
  0xe4   : > { %v1204_v10 = vmax.f32 %v946_v40, %v1014_v63  ;;  %v1235_v18 = vmax.f32 %v1203_v9, %v1111_v5 }
  0xe5   : > { %v877_v36 = vadd.f32 %v876_v29, %v788_v32  ;;  %826 = vmatmul.bf16.gmra.mxu0 %v3115_v22  ;;  %v1185_v22 = vsel %vm1102_vm1, %v1110_v56, 0.0  ;;  %v1335_v29 = vrot.slane %v1279_v46, 3  ;;  %v1391_v46 = vrot.slane %v1280_v15, 6 }
  0xe6   : > { %915 = vmatmul.bf16.gmra.mxu1 %v3119_v23  ;;  %v1236_v25 = vmax.f32 %v1204_v10, %v1185_v22 }
  0xe7   : > { %v947_v33 = vmax.f32 %v877_v36, 0.0  ;;  %v1441_v34 = vsel %vm1440_vm3, %v1432_v24, %v1335_v29  ;;  %v3140_v24 = vld [vmem:[%s3961_s22 + $0xe8] sm:$0xf0] }
  0xe8   : > { %v1450_v40 = vsel %vm1449_vm4, %v1441_v34, %v1359_v30 }
  0xe9   : > { %v1015_v51 = vrot.slane %v947_v33, 7  ;;  %v1112_v6 = vrot.slane %v947_v33, 1  ;;  %v1459_v50 = vsel %vm1458_vm5, %v1450_v40, %v1375_v41 }
  0xea   : > { %v789_v47 = vpop.f32.mrf.mxu0  ;;  %v1468_v57 = vsel %vm1467_vm6, %v1459_v50, %v1391_v46 }
  0xeb   : > { %v878_v49 = vpop.f32.mrf.mxu1  ;;  %v790_v52 = vadd.f32 %v4012_v20, %v789_v47  ;;  %v1089_v0 = vsel %vm1005_vm0, 0.0, %v1015_v51  ;;  %v3581_v47 = vld [vmem:[%s3961_s22 + $0xd4] sm:$0xf0]  ;;  %v1476_v4 = vsel %vm1102_vm1, %v1468_v57, %v1407_v60 }
  0xec   : > { %v1205_v11 = vmax.f32 %v947_v33, %v1089_v0 }
  0xed   : > { %v879_v48 = vadd.f32 %v878_v49, %v790_v52  ;;  %v3580_v49 = vld [vmem:[%s3961_s22 + $0xd4] sm:$0xf] }
  0xee   : > { %v3135_v58 = vor.u32 %v3580_v49, %v3132_v45 }
  0xef   : > { %v948_v1 = vmax.f32 %v879_v48, 0.0  ;;  %v3131_v48 = vor.u32 %v3581_v47, %v3130_v42 }
  0xf1   : > { %v1016_v7 = vrot.slane %v948_v1, 7  ;;  %v1113_v8 = vrot.slane %v948_v1, 1 }
  0xf2   : > { %v792_v12 = vpop.f32.mrf.mxu0 }
  0xf3   : > { %v881_v13 = vpop.f32.mrf.mxu1  ;;  %v1017_v16 = vsel %vm1005_vm0, %v1015_v51, %v1016_v7  ;;  %v1114_v17 = vsel %vm1102_vm1, %v1112_v6, %v1113_v8  ;;  %v1186_v23 = vsel %vm1102_vm1, %v1113_v8, 0.0  ;;  %v793_v51 = vadd.f32 %v4012_v20, %v792_v12 }
  0xf4   : > { %v1206_v19 = vmax.f32 %v948_v1, %v1017_v16  ;;  %v4118_v21 = vmax.f32 %v1205_v11, %v1114_v17  ;;  %v3138_v17 = vld [vmem:[%s3961_s22 + $0xe0] sm:$0xf] }
  0xf5   : > { %831 = vmatmul.bf16.gmra.mxu0 %v3123_v2  ;;  %v882_v1 = vadd.f32 %v881_v13, %v793_v51 }
  0xf6   : > { %920 = vmatmul.bf16.gmra.mxu1 %v3127_v3  ;;  %v4123_v26 = vmax.f32 %v1206_v19, %v1186_v23  ;;  %v1265_v28 = vmax.f32 %v1235_v18, %v4118_v21  ;;  %v3583_v18 = vld [vmem:[%s3961_s22 + $0xe4] sm:$0xf0]  ;;  %v3582_v23 = vld [vmem:[%s3961_s22 + $0xe4] sm:$0xf] }
  0xf7   : > { %v949_v8 = vmax.f32 %v882_v1, 0.0  ;;  %v3143_v34 = vor.u32 %v3582_v23, %v3140_v24  ;;  %v3148_v1 = vld [vmem:[%s3961_s22 + $0xf8] sm:$0xf0] }
  0xf8   : > { %v1266_v31 = vmax.f32 %v1236_v25, %v4123_v26  ;;  %v1281_v32 = vmax.f32 %v1265_v28, %v4096_v27 }
  0xf9   : > { %v1018_v13 = vrot.slane %v949_v8, 7  ;;  %v1115_v25 = vrot.slane %v949_v8, 1 }
  0xfa   : > { %v1282_v35 = vmax.f32 %v1266_v31, %v1234_v44  ;;  %v794_v36 = vpop.f32.mrf.mxu0  ;;  %v1304_v38 = vrot.slane %v1281_v32, 1  ;;  %v1320_v39 = vrot.slane %v1281_v32, 2  ;;  %v1336_v43 = vrot.slane %v1281_v32, 3 }
  0xfb   : > { %v883_v37 = vpop.f32.mrf.mxu1  ;;  %v795_v52 = vadd.f32 %v4012_v20, %v794_v36  ;;  %v1090_v28 = vsel %vm1005_vm0, 0.0, %v1018_v13 }
  0xfc   : > { %v1360_v33 = vrot.slane %v1282_v35, 4  ;;  %v1424_v27 = vsel %vm1005_vm0, %v1281_v32, %v1304_v38  ;;  %v1376_v53 = vrot.slane %v1282_v35, 5  ;;  %v1392_v55 = vrot.slane %v1282_v35, 6 }
  0xfd   : > { %v1433_v44 = vsel %vm1431_vm2, %v1424_v27, %v1320_v39  ;;  %v1408_v63 = vrot.slane %v1282_v35, 7  ;;  %v884_v2 = vadd.f32 %v883_v37, %v795_v52  ;;  %v3139_v32 = vor.u32 %v3583_v18, %v3138_v17 }
  0xfe   : > { %v1442_v54 = vsel %vm1440_vm3, %v1433_v44, %v1336_v43  ;;  %v1207_v39 = vmax.f32 %v949_v8, %v1090_v28 }
  0xff   : > { %v1451_v56 = vsel %vm1449_vm4, %v1442_v54, %v1360_v33  ;;  %v950_v9 = vmax.f32 %v884_v2, 0.0 }
 0x100   : > { %v1460_v59 = vsel %vm1458_vm5, %v1451_v56, %v1376_v53 }
 0x101   : > { %v1469_v0 = vsel %vm1467_vm6, %v1460_v59, %v1392_v55  ;;  %v1019_v14 = vrot.slane %v950_v9, 7  ;;  %v1116_v19 = vrot.slane %v950_v9, 1 }
 0x102   : > { %v797_v61 = vpop.f32.mrf.mxu0  ;;  %v1477_v5 = vsel %vm1102_vm1, %v1469_v0, %v1408_v63  ;;  %v3585_v63 = vld [vmem:[%s3961_s22 + $0xf4] sm:$0xf0]  ;;  %v3584_v0 = vld [vmem:[%s3961_s22 + $0xf4] sm:$0xf] }
 0x103   : > { %v886_v62 = vpop.f32.mrf.mxu1  ;;  %v798_v3 = vadd.f32 %v4012_v20, %v797_v61  ;;  %v4147_v7 = vpack.c.bf16 %v1477_v5, %v1476_v4  ;;  %v1020_v29 = vsel %vm1005_vm0, %v1018_v13, %v1019_v14  ;;  %v1117_v35 = vsel %vm1102_vm1, %v1115_v25, %v1116_v19  ;;  %v3146_v61 = vld [vmem:[%s3961_s22 + $0xf0] sm:$0xf]  ;;  %s3742_s22 = sshra.s32 %s2964_s17, 4  ;;  %s3743_s22 = int_to_ptr.hbm [resolvable:$true] %s3742_s22 }
 0x104   : > { %v1208_v40 = vmax.f32 %v950_v9, %v1020_v29  ;;  %v1239_v27 = vmax.f32 %v1207_v39, %v1117_v35  ;;  %v1187_v45 = vsel %vm1102_vm1, %v1116_v19, 0.0  ;;  %v3147_v8 = vor.u32 %v3585_v63, %v3146_v61  ;;  %s3744_s21 = scalar_lea.hbm %s3743_s22, 1  ;;  %p3749_p0 = scmp.lt.s32.totalorder %s3743_s22, %s5038_s13 }
 0x105   : > { %v887_v6 = vadd.f32 %v886_v62, %v798_v3  ;;  %836 = vmatmul.bf16.gmra.mxu0 %v3131_v48  ;;  %3264 = vmatmul.msk.bf16.vlgmr.msra.gmra.mxu2 %vm1576_vm7, %v4147_v7  ;;  %v3151_v9 = vor.u32 %v3584_v0, %v3148_v1  ;;  %p3745_p11 = scmp.ne.s32.totalorder %s3743_s22, %s3744_s21  ;;  %p3750_p1 = scmp.lt.s32.totalorder %s3748_s14, %s3744_s21 }
 0x106   : > { %925 = vmatmul.bf16.gmra.mxu1 %v3135_v58  ;;  %3268 = vmatmul.msk.bf16.vlgmr.msra.gmra.mxu3 %vm1576_vm7, %v4147_v7  ;;  %v1240_v50 = vmax.f32 %v1208_v40, %v1187_v45 }
 0x107   : > { %v951_v10 = vmax.f32 %v887_v6, 0.0  ;;  %p3746_p12 = pnand %p3745_p11, %p3904_p5  ;;  %p3751_p2 = por %p3750_p1, %p3749_p0 }
 0x109   : > { %v1021_v15 = vrot.slane %v951_v10, 7  ;;  %v1118_v36 = vrot.slane %v951_v10, 1  ;;  %p3747_p13 = pneg %p3746_p12 }
 0x10a   : > { %v799_v11 = vpop.f32.mrf.mxu0 }
 0x10b   : > { %v888_v12 = vpop.f32.mrf.mxu1  ;;  %v800_v16 = vadd.f32 %v4012_v20, %v799_v11  ;;  %v1091_v30 = vsel %vm1005_vm0, 0.0, %v1021_v15  ;;  %p3752_p3 = pnand %p3751_p2, %p3747_p13 }
 0x10c   : > { %v1209_v33 = vmax.f32 %v951_v10, %v1091_v30 }
 0x10d   : > { %v889_v22 = vadd.f32 %v888_v12, %v800_v16 }
 0x10f   : > { %v952_v31 = vmax.f32 %v889_v22, 0.0 }
 0x111   : > { %v1022_v37 = vrot.slane %v952_v31, 7  ;;  %v1119_v38 = vrot.slane %v952_v31, 1 }
 0x112   : > { %v802_v41 = vpop.f32.mrf.mxu0 }
 0x113   : > { %v891_v42 = vpop.f32.mrf.mxu1  ;;  %v1023_v43 = vsel %vm1005_vm0, %v1021_v15, %v1022_v37  ;;  %v1120_v46 = vsel %vm1102_vm1, %v1118_v36, %v1119_v38  ;;  %v1188_v44 = vsel %vm1102_vm1, %v1119_v38, 0.0  ;;  %v803_v3 = vadd.f32 %v4012_v20, %v802_v41 }
 0x114   : > { %v1210_v47 = vmax.f32 %v952_v31, %v1023_v43  ;;  %v4164_v49 = vmax.f32 %v1209_v33, %v1120_v46 }
 0x115   : > { %841 = vmatmul.bf16.gmra.mxu0 %v3139_v32  ;;  %v892_v15 = vadd.f32 %v891_v42, %v803_v3 }
 0x116   : > { %930 = vmatmul.bf16.gmra.mxu1 %v3143_v34  ;;  %v4168_v51 = vmax.f32 %v1210_v47, %v1188_v44  ;;  %v1267_v52 = vmax.f32 %v1239_v27, %v4164_v49 }
 0x117   : > { %v953_v22 = vmax.f32 %v892_v15, 0.0 }
 0x118   : > { %v1268_v53 = vmax.f32 %v1240_v50, %v4168_v51  ;;  %v1283_v54 = vmax.f32 %v1267_v52, %v4118_v21 }
 0x119   : > { %v1024_v29 = vrot.slane %v953_v22, 7  ;;  %v1121_v36 = vrot.slane %v953_v22, 1 }
 0x11a   : > { %v1284_v55 = vmax.f32 %v1268_v53, %v4123_v26  ;;  %v804_v56 = vpop.f32.mrf.mxu0  ;;  %v1305_v58 = vrot.slane %v1283_v54, 1  ;;  %v1321_v59 = vrot.slane %v1283_v54, 2  ;;  %v1337_v62 = vrot.slane %v1283_v54, 3 }
 0x11b   : > { %v893_v48 = vpop.f32.mrf.mxu1  ;;  %v805_v21 = vadd.f32 %v4012_v20, %v804_v56  ;;  %v1092_v37 = vsel %vm1005_vm0, 0.0, %v1024_v29 }
 0x11c   : > { %v1361_v57 = vrot.slane %v1284_v55, 4  ;;  %v1425_v60 = vsel %vm1005_vm0, %v1283_v54, %v1305_v58  ;;  %v1377_v4 = vrot.slane %v1284_v55, 5  ;;  %v1393_v5 = vrot.slane %v1284_v55, 6 }
 0x11d   : > { %v1434_v2 = vsel %vm1431_vm2, %v1425_v60, %v1321_v59  ;;  %v1409_v13 = vrot.slane %v1284_v55, 7  ;;  %v894_v16 = vadd.f32 %v893_v48, %v805_v21  ;;  %v1211_v46 = vmax.f32 %v953_v22, %v1092_v37 }
 0x11e   : > { %v1443_v26 = vsel %vm1440_vm3, %v1434_v2, %v1337_v62 }
 0x11f   : > { %v1452_v6 = vsel %vm1449_vm4, %v1443_v26, %v1361_v57  ;;  %v954_v23 = vmax.f32 %v894_v16, 0.0 }
 0x120   : > { %v1461_v10 = vsel %vm1458_vm5, %v1452_v6, %v1377_v4 }
 0x121   : > { %v1470_v14 = vsel %vm1467_vm6, %v1461_v10, %v1393_v5  ;;  %v1025_v30 = vrot.slane %v954_v23, 7  ;;  %v1122_v34 = vrot.slane %v954_v23, 1 }
 0x122   : > { %v807_v11 = vpop.f32.mrf.mxu0  ;;  %v4188_v18 = vsel %vm1102_vm1, %v1470_v14, %v1409_v13 }
 0x123   : > { %v896_v12 = vpop.f32.mrf.mxu1  ;;  %v808_v17 = vadd.f32 %v4012_v20, %v807_v11  ;;  %v1026_v38 = vsel %vm1005_vm0, %v1024_v29, %v1025_v30  ;;  %v1123_v33 = vsel %vm1102_vm1, %v1121_v36, %v1122_v34  ;;  %v1189_v56 = vsel %vm1102_vm1, %v1122_v34, 0.0 }
 0x124   : > { %v1212_v27 = vmax.f32 %v954_v23, %v1026_v38  ;;  %v1243_v53 = vmax.f32 %v1211_v46, %v1123_v33 }
 0x125   : > { %v897_v19 = vadd.f32 %v896_v12, %v808_v17  ;;  %846 = vmatmul.bf16.gmra.mxu0 %v3147_v8 }
 0x126   : > { %935 = vmatmul.bf16.gmra.mxu1 %v3151_v9  ;;  %v1244_v58 = vmax.f32 %v1212_v27, %v1189_v56 }
 0x127   : > { %v955_v24 = vmax.f32 %v897_v19, 0.0 }
 0x129   : > { %v1027_v31 = vrot.slane %v955_v24, 7  ;;  %v1124_v41 = vrot.slane %v955_v24, 1 }
 0x12a   : > { %v809_v25 = vpop.f32.mrf.mxu0 }
 0x12b   : > { %v898_v28 = vpop.f32.mrf.mxu1  ;;  %v810_v32 = vadd.f32 %v4012_v20, %v809_v25  ;;  %v1093_v39 = vsel %vm1005_vm0, 0.0, %v1027_v31 }
 0x12c   : > { %v1213_v47 = vmax.f32 %v955_v24, %v1093_v39 }
 0x12d   : > { %v899_v35 = vadd.f32 %v898_v28, %v810_v32 }
 0x12f   : > { %v956_v40 = vmax.f32 %v899_v35, 0.0 }
 0x131   : > { %v1028_v42 = vrot.slane %v956_v40, 7  ;;  %v1125_v43 = vrot.slane %v956_v40, 1 }
 0x132   : > { %v812_v45 = vpop.f32.mrf.mxu0 }
 0x133   : > { %v901_v44 = vpop.f32.mrf.mxu1  ;;  %v1029_v50 = vsel %vm1005_vm0, %v1027_v31, %v1028_v42  ;;  %v1126_v52 = vsel %vm1102_vm1, %v1124_v41, %v1125_v43  ;;  %v1190_v48 = vsel %vm1102_vm1, %v1125_v43, 0.0  ;;  %v813_v5 = vadd.f32 %v4012_v20, %v812_v45 }
 0x134   : > { %v1214_v54 = vmax.f32 %v956_v40, %v1029_v50  ;;  %v4197_v55 = vmax.f32 %v1213_v47, %v1126_v52 }
 0x135   : > { %v902_v15 = vadd.f32 %v901_v44, %v813_v5 }
 0x136   : > { %v4201_v59 = vmax.f32 %v1214_v54, %v1190_v48  ;;  %v1269_v57 = vmax.f32 %v1243_v53, %v4197_v55 }
 0x137   : > { %v957_v24 = vmax.f32 %v902_v15, 0.0 }
 0x138   : > { %v1270_v61 = vmax.f32 %v1244_v58, %v4201_v59  ;;  %v1285_v62 = vmax.f32 %v1269_v57, %v4164_v49 }
 0x139   : > { %v1030_v31 = vrot.slane %v957_v24, 7 }
 0x13a   : > { %v1286_v60 = vmax.f32 %v1270_v61, %v4168_v51  ;;  %v814_v63 = vpop.f32.mrf.mxu0  ;;  %v1306_v1 = vrot.slane %v1285_v62, 1  ;;  %v1322_v2 = vrot.slane %v1285_v62, 2  ;;  %v1338_v21 = vrot.slane %v1285_v62, 3 }
 0x13b   : > { %v903_v0 = vpop.f32.mrf.mxu1  ;;  %v815_v6 = vadd.f32 %v4012_v20, %v814_v63  ;;  %v1094_v38 = vsel %vm1005_vm0, 0.0, %v1030_v31 }
 0x13c   : > { %v1362_v3 = vrot.slane %v1286_v60, 4  ;;  %v1426_v4 = vsel %vm1005_vm0, %v1285_v62, %v1306_v1  ;;  %v1378_v8 = vrot.slane %v1286_v60, 5  ;;  %v1394_v49 = vrot.slane %v1286_v60, 6 }
 0x13d   : > { %v1435_v26 = vsel %vm1431_vm2, %v1426_v4, %v1322_v2  ;;  %v1410_v13 = vrot.slane %v1286_v60, 7  ;;  %v904_v16 = vadd.f32 %v903_v0, %v815_v6  ;;  %v1215_v27 = vmax.f32 %v957_v24, %v1094_v38 }
 0x13e   : > { %v1444_v9 = vsel %vm1440_vm3, %v1435_v26, %v1338_v21 }
 0x13f   : > { %v1453_v51 = vsel %vm1449_vm4, %v1444_v9, %v1362_v3  ;;  %v958_v25 = vmax.f32 %v904_v16, 0.0 }
 0x140   : > { %v1462_v10 = vsel %vm1458_vm5, %v1453_v51, %v1378_v8 }
 0x141   : > { %v1471_v14 = vsel %vm1467_vm6, %v1462_v10, %v1394_v49  ;;  %v1031_v32 = vrot.slane %v958_v25, 7  ;;  %v1128_v36 = vrot.slane %v958_v25, 1 }
 0x142   : > { %v817_v11 = vpop.f32.mrf.mxu0  ;;  %v1479_v19 = vsel %vm1102_vm1, %v1471_v14, %v1410_v13 }
 0x143   : > { %v906_v12 = vpop.f32.mrf.mxu1  ;;  %v818_v17 = vadd.f32 %v4012_v20, %v817_v11  ;;  %v4218_v23 = vpack.c.bf16 %v1479_v19, %v4188_v18  ;;  %v1127_v18 = vrot.slane %v957_v24, 1  ;;  %v1032_v39 = vsel %vm1005_vm0, %v1030_v31, %v1031_v32 }
 0x144   : > { %v1216_v47 = vmax.f32 %v958_v25, %v1032_v39  ;;  %v1191_v58 = vsel %vm1102_vm1, %v1128_v36, 0.0 }
 0x145   : > { %v907_v22 = vadd.f32 %v906_v12, %v818_v17  ;;  %3265 = vmatmul.msk.bf16.gmra.mxu2 %vm1576_vm7, %v4218_v23  ;;  %3269 = vmatmul.msk.bf16.gmra.mxu3 %vm1576_vm7, %v4218_v23  ;;  %v1129_v41 = vsel %vm1102_vm1, %v1127_v18, %v1128_v36 }
 0x146   : > { %v1247_v54 = vmax.f32 %v1215_v27, %v1129_v41  ;;  %v1248_v61 = vmax.f32 %v1216_v47, %v1191_v58 }
 0x147   : > { %v959_v28 = vmax.f32 %v907_v22, 0.0 }
 0x149   : > { %v1033_v34 = vrot.slane %v959_v28, 7  ;;  %v1130_v42 = vrot.slane %v959_v28, 1 }
 0x14a   : > { %v819_v29 = vpop.f32.mrf.mxu0 }
 0x14b   : > { %v908_v30 = vpop.f32.mrf.mxu1  ;;  %v820_v35 = vadd.f32 %v4012_v20, %v819_v29  ;;  %v1095_v40 = vsel %vm1005_vm0, 0.0, %v1033_v34 }
 0x14c   : > { %v1217_v45 = vmax.f32 %v959_v28, %v1095_v40 }
 0x14d   : > { %v909_v37 = vadd.f32 %v908_v30, %v820_v35 }
 0x14f   : > { %v960_v33 = vmax.f32 %v909_v37, 0.0 }
 0x151   : > { %v1034_v43 = vrot.slane %v960_v33, 7  ;;  %v1131_v46 = vrot.slane %v960_v33, 1 }
 0x152   : > { %v822_v44 = vpop.f32.mrf.mxu0 }
 0x153   : > { %v911_v50 = vpop.f32.mrf.mxu1  ;;  %v1035_v52 = vsel %vm1005_vm0, %v1033_v34, %v1034_v43  ;;  %v1132_v53 = vsel %vm1102_vm1, %v1130_v42, %v1131_v46  ;;  %v1192_v57 = vsel %vm1102_vm1, %v1131_v46, 0.0  ;;  %v823_v9 = vadd.f32 %v4012_v20, %v822_v44 }
 0x154   : > { %v1218_v56 = vmax.f32 %v960_v33, %v1035_v52  ;;  %v4231_v48 = vmax.f32 %v1217_v45, %v1132_v53 }
 0x155   : > { %v912_v16 = vadd.f32 %v911_v50, %v823_v9 }
 0x156   : > { %v4235_v62 = vmax.f32 %v1218_v56, %v1192_v57  ;;  %v1271_v60 = vmax.f32 %v1247_v54, %v4231_v48 }
 0x157   : > { %v961_v25 = vmax.f32 %v912_v16, 0.0 }
 0x158   : > { %v1272_v63 = vmax.f32 %v1248_v61, %v4235_v62  ;;  %v1287_v0 = vmax.f32 %v1271_v60, %v4197_v55 }
 0x159   : > { %v1036_v32 = vrot.slane %v961_v25, 7  ;;  %v1133_v38 = vrot.slane %v961_v25, 1 }
 0x15a   : > { %v1288_v1 = vmax.f32 %v1272_v63, %v4201_v59  ;;  %v824_v2 = vpop.f32.mrf.mxu0  ;;  %v1307_v21 = vrot.slane %v1287_v0, 1  ;;  %v1323_v4 = vrot.slane %v1287_v0, 2  ;;  %v1339_v5 = vrot.slane %v1287_v0, 3 }
 0x15b   : > { %v913_v3 = vpop.f32.mrf.mxu1  ;;  %v825_v49 = vadd.f32 %v4012_v20, %v824_v2  ;;  %v1096_v39 = vsel %vm1005_vm0, 0.0, %v1036_v32 }
 0x15c   : > { %v1363_v26 = vrot.slane %v1288_v1, 4  ;;  %v1427_v6 = vsel %vm1005_vm0, %v1287_v0, %v1307_v21  ;;  %v1379_v51 = vrot.slane %v1288_v1, 5  ;;  %v1395_v55 = vrot.slane %v1288_v1, 6 }
 0x15d   : > { %v1436_v8 = vsel %vm1431_vm2, %v1427_v6, %v1323_v4  ;;  %v1411_v14 = vrot.slane %v1288_v1, 7  ;;  %v914_v17 = vadd.f32 %v913_v3, %v825_v49  ;;  %v1219_v47 = vmax.f32 %v961_v25, %v1096_v39 }
 0x15e   : > { %v1445_v10 = vsel %vm1440_vm3, %v1436_v8, %v1339_v5 }
 0x15f   : > { %v1454_v59 = vsel %vm1449_vm4, %v1445_v10, %v1363_v26  ;;  %v962_v28 = vmax.f32 %v914_v17, 0.0  ;;  %v3613_v10 = vld [vmem:[%s5028_s3 + $0x58] sm:$0xf0] }
 0x160   : > { %v1463_v11 = vsel %vm1458_vm5, %v1454_v59, %v1379_v51  ;;  %v3262_v51 = vld [vmem:[%s5028_s3 + $0x50] sm:$0xf] }
 0x161   : > { %v1472_v15 = vsel %vm1467_vm6, %v1463_v11, %v1395_v55  ;;  %v1037_v34 = vrot.slane %v962_v28, 7  ;;  %v1134_v37 = vrot.slane %v962_v28, 1  ;;  %v3263_v55 = vor.u32 %v3613_v10, %v3262_v51 }
 0x162   : > { %v827_v12 = vpop.f32.mrf.mxu0  ;;  %v4251_v22 = vsel %vm1102_vm1, %v1472_v15, %v1411_v14 }
 0x163   : > { %v916_v13 = vpop.f32.mrf.mxu1  ;;  %v828_v19 = vadd.f32 %v4012_v20, %v827_v12  ;;  %v1038_v40 = vsel %vm1005_vm0, %v1036_v32, %v1037_v34  ;;  %v1135_v42 = vsel %vm1102_vm1, %v1133_v38, %v1134_v37  ;;  %v1193_v61 = vsel %vm1102_vm1, %v1134_v37, 0.0  ;;  %1651 = vmatpush.bf16.msrb.mxu2 %v3263_v55 }
 0x164   : > { %v1220_v45 = vmax.f32 %v962_v28, %v1038_v40  ;;  %v1251_v56 = vmax.f32 %v1219_v47, %v1135_v42 }
 0x165   : > { %v917_v24 = vadd.f32 %v916_v13, %v828_v19 }
 0x166   : > { %v1252_v63 = vmax.f32 %v1220_v45, %v1193_v61 }
 0x167   : > { %v963_v29 = vmax.f32 %v917_v24, 0.0 }
 0x169   : > { %v1039_v35 = vrot.slane %v963_v29, 7  ;;  %v1136_v43 = vrot.slane %v963_v29, 1 }
 0x16a   : > { %v829_v30 = vpop.f32.mrf.mxu0 }
 0x16b   : > { %v918_v31 = vpop.f32.mrf.mxu1  ;;  %v830_v36 = vadd.f32 %v4012_v20, %v829_v30  ;;  %v1097_v33 = vsel %vm1005_vm0, 0.0, %v1039_v35 }
 0x16c   : > { %v1221_v44 = vmax.f32 %v963_v29, %v1097_v33 }
 0x16d   : > { %v919_v18 = vadd.f32 %v918_v31, %v830_v36  ;;  %v4289_v31 = vld [vmem:[%s5029_s4] sm:$0x7] }
 0x16e   : > { %v4302_v36 = vperm.slane %v4289_v31, 1 }
 0x16f   : > { %v964_v41 = vmax.f32 %v919_v18, 0.0 }
 0x171   : > { %v1040_v46 = vrot.slane %v964_v41, 7  ;;  %v1137_v27 = vrot.slane %v964_v41, 1 }
 0x172   : > { %v832_v50 = vpop.f32.mrf.mxu0 }
 0x173   : > { %v921_v52 = vpop.f32.mrf.mxu1  ;;  %v1041_v53 = vsel %vm1005_vm0, %v1039_v35, %v1040_v46  ;;  %v1138_v54 = vsel %vm1102_vm1, %v1136_v43, %v1137_v27  ;;  %v1194_v60 = vsel %vm1102_vm1, %v1137_v27, 0.0  ;;  %v833_v11 = vadd.f32 %v4012_v20, %v832_v50  ;;  %v3610_v50 = vld [vmem:[%s5028_s3 + $0x40] sm:$0xf0] }
 0x174   : > { %v1222_v58 = vmax.f32 %v964_v41, %v1041_v53  ;;  %v4260_v57 = vmax.f32 %v1221_v44, %v1138_v54  ;;  %v4299_v35 = vperm.slane %v4289_v31, 0  ;;  %v3250_v44 = vld [vmem:[%s5028_s3 + $0x38] sm:$0xf] }
 0x175   : > { %v922_v28 = vadd.f32 %v921_v52, %v833_v11  ;;  %v3251_v54 = vor.u32 %v3610_v50, %v3250_v44 }
 0x176   : > { %v4264_v0 = vmax.f32 %v1222_v58, %v1194_v60  ;;  %v1273_v1 = vmax.f32 %v1251_v56, %v4260_v57 }
 0x177   : > { %v965_v37 = vmax.f32 %v922_v28, 0.0  ;;  %1652 = vmatpush.bf16.msrb.mxu2 %v3251_v54  ;;  %v3604_v54 = vld [vmem:[%s5028_s3 + $0x10] sm:$0xf0] }
 0x178   : > { %v1274_v2 = vmax.f32 %v1252_v63, %v4264_v0  ;;  %v1289_v3 = vmax.f32 %v1273_v1, %v4231_v48 }
 0x179   : > { %v1042_v43 = vrot.slane %v965_v37, 7  ;;  %v1139_v56 = vrot.slane %v965_v37, 1 }
 0x17a   : > { %v1290_v21 = vmax.f32 %v1274_v2, %v4235_v62  ;;  %v834_v4 = vpop.f32.mrf.mxu0  ;;  %v1308_v5 = vrot.slane %v1289_v3, 1  ;;  %v1324_v6 = vrot.slane %v1289_v3, 2  ;;  %v1340_v9 = vrot.slane %v1289_v3, 3 }
 0x17b   : > { %v923_v26 = vpop.f32.mrf.mxu1  ;;  %v835_v12 = vadd.f32 %v4012_v20, %v834_v4  ;;  %v1098_v58 = vsel %vm1005_vm0, 0.0, %v1042_v43 }
 0x17c   : > { %v1364_v8 = vrot.slane %v1290_v21, 4  ;;  %v1428_v49 = vsel %vm1005_vm0, %v1289_v3, %v1308_v5  ;;  %v1380_v62 = vrot.slane %v1290_v21, 5  ;;  %v1396_v13 = vrot.slane %v1290_v21, 6 }
 0x17d   : > { %v1437_v48 = vsel %vm1431_vm2, %v1428_v49, %v1324_v6  ;;  %v1412_v19 = vrot.slane %v1290_v21, 7  ;;  %v924_v29 = vadd.f32 %v923_v26, %v835_v12  ;;  %v1223_v21 = vmax.f32 %v965_v37, %v1098_v58 }
 0x17e   : > { %v1446_v59 = vsel %vm1440_vm3, %v1437_v48, %v1340_v9 }
 0x17f   : > { %v1455_v14 = vsel %vm1449_vm4, %v1446_v59, %v1364_v8  ;;  %v966_v18 = vmax.f32 %v924_v29, 0.0 }
 0x180   : > { %v1464_v15 = vsel %vm1458_vm5, %v1455_v14, %v1380_v62 }
 0x181   : > { %v1473_v24 = vsel %vm1467_vm6, %v1464_v15, %v1396_v13  ;;  %v1043_v46 = vrot.slane %v966_v18, 7  ;;  %v1140_v52 = vrot.slane %v966_v18, 1 }
 0x182   : > { %v837_v16 = vpop.f32.mrf.mxu0  ;;  %v1481_v30 = vsel %vm1102_vm1, %v1473_v24, %v1412_v19  ;;  %v3607_v19 = vld [vmem:[%s5028_s3 + $0x28] sm:$0xf0] }
 0x183   : > { %v926_v17 = vpop.f32.mrf.mxu1  ;;  %v838_v25 = vadd.f32 %v4012_v20, %v837_v16  ;;  %v4292_v34 = vpack.c.bf16 %v1481_v30, %v4251_v22  ;;  %v1044_v61 = vsel %vm1005_vm0, %v1042_v43, %v1043_v46  ;;  %v1141_v63 = vsel %vm1102_vm1, %v1139_v56, %v1140_v52 }
 0x184   : > { %v1224_v4 = vmax.f32 %v966_v18, %v1044_v61  ;;  %v1255_v49 = vmax.f32 %v1223_v21, %v1141_v63  ;;  %v1195_v48 = vsel %vm1102_vm1, %v1140_v52, 0.0 }
 0x185   : > { %v927_v32 = vadd.f32 %v926_v17, %v838_v25  ;;  %3266 = vmatmul.msk.bf16.gmra.mxu2 %vm1576_vm7, %v4292_v34  ;;  %3270 = vmatmul.msk.bf16.gmra.mxu3 %vm1576_vm7, %v4292_v34  ;;  %v3238_v17 = vld [vmem:[%s5028_s3 + $0x20] sm:$0xf] }
 0x186   : > { %v1256_v62 = vmax.f32 %v1224_v4, %v1195_v48  ;;  %v3239_v28 = vor.u32 %v3607_v19, %v3238_v17 }
 0x187   : > { %v967_v38 = vmax.f32 %v927_v32, 0.0  ;;  %v3727_v32 = vld [vmem:[%s5027_s2] ss:$0 sm:$0xff] }
 0x188   : > { %v1598_v39 = vpop.f32.mrf.mxu2  ;;  %1653 = vmatpush.bf16.msrb.mxu2 %v3239_v28 }
 0x189   : > { %v1627_v40 = vpop.f32.mrf.mxu3  ;;  %v1599_v22 = vadd.f32 %v1598_v39, %v4299_v35  ;;  %v1045_v27 = vrot.slane %v967_v38, 7  ;;  %v1142_v1 = vrot.slane %v967_v38, 1 }
 0x18a   : > { %v1628_v33 = vadd.f32 %v1627_v40, %v4302_v36  ;;  %v839_v41 = vpop.f32.mrf.mxu0 }
 0x18b   : > { %v928_v42 = vpop.f32.mrf.mxu1  ;;  %v840_v47 = vadd.f32 %v4012_v20, %v839_v41  ;;  %v1099_v20 = vsel %vm1005_vm0, 0.0, %v1045_v27 }
 0x18c   : > { %v4307_v45 = vpack.c.bf16 %v1628_v33, %v1599_v22  ;;  %v1225_v26 = vmax.f32 %v967_v38, %v1099_v20 }
 0x18d   : > { %v929_v53 = vadd.f32 %v928_v42, %v840_v47 }
 0x18f   : > { %v968_v60 = vmax.f32 %v929_v53, 0.0  ;;  %v3226_v53 = vld [vmem:[%s5028_s3 + $0x8] sm:$0xf] }
 0x190   : > { %v3227_v20 = vor.u32 %v3604_v54, %v3226_v53 }
 0x191   : > { %v1046_v2 = vrot.slane %v968_v60, 7  ;;  %v1143_v3 = vrot.slane %v968_v60, 1 }
 0x192   : > { %v842_v5 = vpop.f32.mrf.mxu0  ;;  %1654 = vmatpush.bf16.msrb.mxu2 %v3227_v20 }
 0x193   : > { %v931_v6 = vpop.f32.mrf.mxu1  ;;  %v1047_v8 = vsel %vm1005_vm0, %v1045_v27, %v1046_v2  ;;  %v1144_v9 = vsel %vm1102_vm1, %v1142_v1, %v1143_v3  ;;  %v1196_v55 = vsel %vm1102_vm1, %v1143_v3, 0.0  ;;  %v843_v37 = vadd.f32 %v3727_v32, %v842_v5 }
 0x194   : > { %v1226_v51 = vmax.f32 %v968_v60, %v1047_v8  ;;  %v4321_v10 = vmax.f32 %v1225_v26, %v1144_v9 }
 0x195   : > { %v932_v27 = vadd.f32 %v931_v6, %v843_v37 }
 0x196   : > { %v4325_v59 = vmax.f32 %v1226_v51, %v1196_v55  ;;  %v1275_v11 = vmax.f32 %v1255_v49, %v4321_v10 }
 0x197   : > { %v969_v56 = vmax.f32 %v932_v27, 0.0  ;;  %v4369_v27 = vpop.f32.mrf.mxu3 }
 0x198   : > { %v1276_v12 = vmax.f32 %v1256_v62, %v4325_v59  ;;  %v1291_v13 = vmax.f32 %v1275_v11, %v4260_v57 }
 0x199   : > { %v1048_v63 = vrot.slane %v969_v56, 7  ;;  %v1145_v5 = vrot.slane %v969_v56, 1 }
 0x19a   : > { %v1292_v14 = vmax.f32 %v1276_v12, %v4264_v0  ;;  %v844_v15 = vpop.f32.mrf.mxu0  ;;  %v1309_v24 = vrot.slane %v1291_v13, 1  ;;  %v1325_v25 = vrot.slane %v1291_v13, 2  ;;  %v1341_v30 = vrot.slane %v1291_v13, 3 }
 0x19b   : > { %v933_v16 = vpop.f32.mrf.mxu1  ;;  %v845_v18 = vadd.f32 %v3727_v32, %v844_v15  ;;  %v1100_v6 = vsel %vm1005_vm0, 0.0, %v1048_v63 }
 0x19c   : > { %v1365_v29 = vrot.slane %v1292_v14, 4  ;;  %v1429_v57 = vsel %vm1005_vm0, %v1291_v13, %v1309_v24  ;;  %v1381_v38 = vrot.slane %v1292_v14, 5  ;;  %v1397_v40 = vrot.slane %v1292_v14, 6 }
 0x19d   : > { %v1438_v0 = vsel %vm1431_vm2, %v1429_v57, %v1325_v25  ;;  %v1413_v43 = vrot.slane %v1292_v14, 7  ;;  %v934_v47 = vadd.f32 %v933_v16, %v845_v18  ;;  %v1227_v11 = vmax.f32 %v969_v56, %v1100_v6 }
 0x19e   : > { %v1447_v39 = vsel %vm1440_vm3, %v1438_v0, %v1341_v30 }
 0x19f   : > { %v1456_v22 = vsel %vm1449_vm4, %v1447_v39, %v1365_v29  ;;  %v970_v58 = vmax.f32 %v934_v47, 0.0 }
 0x1a0   : > { %v1465_v33 = vsel %vm1458_vm5, %v1456_v22, %v1381_v38 }
 0x1a1   : > { %v1474_v46 = vsel %vm1467_vm6, %v1465_v33, %v1397_v40  ;;  %v1049_v1 = vrot.slane %v970_v58, 7  ;;  %v1146_v4 = vrot.slane %v970_v58, 1 }
 0x1a2   : > { %v847_v41 = vpop.f32.mrf.mxu0  ;;  %v1482_v50 = vsel %vm1102_vm1, %v1474_v46, %v1413_v43  ;;  %v4367_v46 = vpop.f32.mrf.mxu2 }
 0x1a3   : > { %v936_v42 = vpop.f32.mrf.mxu1  ;;  %v848_v44 = vadd.f32 %v3727_v32, %v847_v41  ;;  %v1050_v8 = vsel %vm1005_vm0, %v1048_v63, %v1049_v1  ;;  %v1147_v51 = vsel %vm1102_vm1, %v1145_v5, %v1146_v4  ;;  %v1197_v24 = vsel %vm1102_vm1, %v1146_v4, 0.0 }
 0x1a4   : > { %v1228_v12 = vmax.f32 %v970_v58, %v1050_v8  ;;  %v1259_v16 = vmax.f32 %v1227_v11, %v1147_v51  ;;  %v4407_v51 = vperm.slane %v4289_v31, 2 }
 0x1a5   : > { %v937_v52 = vadd.f32 %v936_v42, %v848_v44 }
 0x1a6   : > { %v1260_v28 = vmax.f32 %v1228_v12, %v1197_v24 }
 0x1a7   : > { %v971_v61 = vmax.f32 %v937_v52, 0.0 }
 0x1a9   : > { %v1051_v2 = vrot.slane %v971_v61, 7  ;;  %v1148_v48 = vrot.slane %v971_v61, 1 }
 0x1aa   : > { %v849_v60 = vpop.f32.mrf.mxu0 }
 0x1ab   : > { %v850_v3 = vadd.f32 %v3727_v32, %v849_v60  ;;  %v938_v21 = vpop.f32.mrf.mxu1  ;;  %v1101_v9 = vsel %vm1005_vm0, 0.0, %v1051_v2 }
 0x1ac   : > { %v1229_v13 = vmax.f32 %v971_v61, %v1101_v9 }
 0x1ad   : > { %v939_v26 = vadd.f32 %v938_v21, %v850_v3 }
 0x1af   : > { %v972_v49 = vmax.f32 %v939_v26, 0.0 }
 0x1b1   : > { %v1052_v55 = vrot.slane %v972_v49, 7  ;;  %v1149_v62 = vrot.slane %v972_v49, 1 }
 0x1b3   : > { %v1053_v14 = vsel %vm1005_vm0, %v1051_v2, %v1052_v55  ;;  %v1150_v15 = vsel %vm1102_vm1, %v1148_v48, %v1149_v62  ;;  %v1198_v25 = vsel %vm1102_vm1, %v1149_v62, 0.0 }
 0x1b4   : > { %v1230_v17 = vmax.f32 %v972_v49, %v1053_v14  ;;  %v1261_v19 = vmax.f32 %v1229_v13, %v1150_v15 }
 0x1b6   : > { %v1262_v29 = vmax.f32 %v1230_v17, %v1198_v25  ;;  %v1277_v30 = vmax.f32 %v1259_v16, %v1261_v19 }
 0x1b8   : > { %v1278_v57 = vmax.f32 %v1260_v28, %v1262_v29  ;;  %v1293_v0 = vmax.f32 %v1277_v30, %v4321_v10 }
 0x1ba   : > { %v1294_v32 = vmax.f32 %v1278_v57, %v4325_v59  ;;  %v1310_v37 = vrot.slane %v1293_v0, 1  ;;  %v1326_v18 = vrot.slane %v1293_v0, 2  ;;  %v1342_v39 = vrot.slane %v1293_v0, 3 }
 0x1bc   : > { %v1366_v38 = vrot.slane %v1294_v32, 4  ;;  %v1430_v40 = vsel %vm1005_vm0, %v1293_v0, %v1310_v37  ;;  %v1382_v33 = vrot.slane %v1294_v32, 5  ;;  %v1398_v42 = vrot.slane %v1294_v32, 6 }
 0x1bd   : > { %v1439_v22 = vsel %vm1431_vm2, %v1430_v40, %v1326_v18  ;;  %v1414_v10 = vrot.slane %v1294_v32, 7 }
 0x1be   : > { %v1448_v41 = vsel %vm1440_vm3, %v1439_v22, %v1342_v39 }
 0x1bf   : > { %v1457_v43 = vsel %vm1449_vm4, %v1448_v41, %v1366_v38 }
 0x1c0   : > { %v1466_v59 = vsel %vm1458_vm5, %v1457_v43, %v1382_v33 }
 0x1c1   : > { %v1475_v47 = vsel %vm1467_vm6, %v1466_v59, %v1398_v42  ;;  %v3621_v59 = vld [vmem:[%s5030_s5 + $0x38] sm:$0xff] }
 0x1c2   : > { %v1483_v44 = vsel %vm1102_vm1, %v1475_v47, %v1414_v10  ;;  %2368 = vmatpush.bf16.msrb.mxu3 %v3621_v59 }
 0x1c3   : > { %v1487_v52 = vpack.c.bf16 %v1483_v44, %v1482_v50 }
 0x1c5   : > { %3267 = vmatmul.msk.bf16.gmra.mxu2 %vm1576_vm7, %v1487_v52  ;;  %3271 = vmatmul.msk.bf16.gmra.mxu3 %vm1576_vm7, %v1487_v52 }
 0x1c8   : > { %v1603_v53 = vpop.f32.mrf.mxu2  ;;  %v1632_v54 = vpop.f32.mrf.mxu3 }
 0x1c9   : > { %v1604_v56 = vadd.f32 %v1603_v53, %v4299_v35  ;;  %v1633_v58 = vadd.f32 %v1632_v54, %v4302_v36 }
 0x1cb   : > { %v4378_v61 = vpack.c.bf16 %v1633_v58, %v1604_v56 }
 0x1d0   : > { %v4386_v50 = vpop.f32.mrf.mxu2  ;;  %v4388_v20 = vpop.f32.mrf.mxu3 }
 0x1d5   : > { %3272 = vmatmul.msk.bf16.vlgmr.msrb.gmra.mxu2 %vm1576_vm7, %v4147_v7  ;;  %v3792_v7 = vmov 0.0|0.0  }
 0x1d6   : > { %v1790_v21 = vunpack.c.l.b16 %v3792_v7 }
 0x1e5   : > { %3273 = vmatmul.msk.bf16.gmra.mxu2 %vm1576_vm7, %v4218_v23  ;;  %v1798_v23 = vpack.c.b16 %v1790_v21, %v1790_v21 }
 0x1e7   : > { %1806 = vrot.lane.b32.xlu0 %v1798_v23, %s3793_s30 }
 0x1f5   : > { %3274 = vmatmul.msk.bf16.gmra.mxu2 %vm1576_vm7, %v4292_v34 }
 0x205   : > { %3275 = vmatmul.msk.bf16.gmra.mxu2 %vm1576_vm7, %v1487_v52 }
 0x208   : > { %v1608_v60 = vpop.f32.mrf.mxu2  ;;  %v1637_v63 = vpop.f32.mrf.mxu3 }
 0x209   : > { %v1609_v1 = vadd.f32 %v1608_v60, %v4299_v35  ;;  %v1638_v2 = vadd.f32 %v1637_v63, %v4302_v36  ;;  %v3620_v63 = vld [vmem:[%s5030_s5 + $0x30] sm:$0xff] }
 0x20a   : > { %2369 = vmatpush.bf16.msrb.mxu3 %v3620_v63 }
 0x20b   : > { %v4393_v3 = vpack.c.bf16 %v1638_v2, %v1609_v1 }
 0x210   : > { %v4396_v34 = vpop.f32.mrf.mxu2  ;;  %v4398_v4 = vpop.f32.mrf.mxu3 }
 0x248   : > { %v1613_v26 = vpop.f32.mrf.mxu2  ;;  %v1642_v5 = vpop.f32.mrf.mxu3 }
 0x249   : > { %v1614_v6 = vadd.f32 %v1613_v26, %v4299_v35  ;;  %v1643_v8 = vadd.f32 %v1642_v5, %v4302_v36 }
 0x24b   : > { %v4402_v9 = vpack.c.bf16 %v1643_v8, %v1614_v6 }
 0x250   : > { %v4404_v49 = vpop.f32.mrf.mxu2 }
 0x258   : > { %v1656_v48 = vpop.f32.mrf.mxu2 }
 0x259   : > { %v1657_v55 = vadd.f32 %v1656_v48, %v4407_v51 }
 0x25b   : > { %v4410_v62 = vmax.f32 %v1657_v55, 0.0 }
 0x25d   : > { %v4414_v11 = vpack.c.bf16 %v4410_v62, %v4410_v62  ;;  %v1701_v56 = vrot.slane %v4410_v62, 7 }
 0x25f   : > { %v1791_v12 = vunpack.c.l.b16 %v4414_v11  ;;  %v1717_v7 = vsel %vm1005_vm0, 0.0, %v1701_v56 }
 0x260   : > { %v1658_v13 = vpop.f32.mrf.mxu2  ;;  %v4481_v55 = vpack.c.bf16 %v1717_v7, %v1717_v7 }
 0x261   : > { %v1659_v14 = vadd.f32 %v1658_v13, %v4407_v51  ;;  %v1799_v15 = vpack.c.b16 %v1791_v12, %v1791_v12 }
 0x263   : > { %v1685_v16 = vmax.f32 %v1659_v14, 0.0  ;;  %1808 = vrot.lane.b32.xlu0 %v1799_v15, %s3793_s30 }
 0x265   : > { %v4419_v31 = vpack.c.bf16 %v1685_v16, %v1685_v16  ;;  %v1742_v17 = vrot.slane %v1685_v16, 1  ;;  %v1702_v12 = vrot.slane %v1685_v16, 7  ;;  %v1830_v16 = vunpack.c.l.b16 %v4481_v55 }
 0x267   : > { %v1792_v19 = vunpack.c.l.b16 %v4419_v31  ;;  %v1758_v30 = vsel %vm1102_vm1, %v1742_v17, 0.0  ;;  %v3619_v17 = vld [vmem:[%s5030_s5 + $0x28] sm:$0xff] }
 0x268   : > { %v1661_v24 = vpop.f32.mrf.mxu2  ;;  %v4432_v32 = vpack.c.bf16 %v1758_v30, %v1758_v30  ;;  %2370 = vmatpush.bf16.msrb.mxu3 %v3619_v17 }
 0x269   : > { %v1662_v25 = vadd.f32 %v1661_v24, %v4407_v51  ;;  %v1800_v28 = vpack.c.b16 %v1792_v19, %v1792_v19 }
 0x26a   : > { %v4440_v33 = vunpack.c.l.b16 %v4432_v32 }
 0x26b   : > { %v4423_v29 = vmax.f32 %v1662_v25, 0.0  ;;  %1810 = vrot.lane.b32.xlu1 %v1800_v28, %s3793_s30  ;;  %v1718_v25 = vsel %vm1005_vm0, 0.0, %v1702_v12 }
 0x26c   : > { %v1879_v12 = vpack.c.b16 %v4440_v33, %v4440_v33 }
 0x26d   : > { %v4429_v57 = vpack.c.bf16 %v4423_v29, %v4423_v29  ;;  %v1743_v0 = vrot.slane %v4423_v29, 1  ;;  %v1703_v59 = vrot.slane %v4423_v29, 7 }
 0x26f   : > { %v1759_v37 = vsel %vm1102_vm1, %v1743_v0, 0.0  ;;  %v1793_v18 = vunpack.c.l.b16 %v4429_v57  ;;  %v1719_v29 = vsel %vm1005_vm0, 0.0, %v1703_v59 }
 0x270   : > { %v4436_v38 = vpack.c.bf16 %v1759_v37, %v1759_v37  ;;  %v1663_v39 = vpop.f32.mrf.mxu2 }
 0x271   : > { %v1664_v40 = vadd.f32 %v1663_v39, %v4407_v51  ;;  %v1801_v22 = vpack.c.b16 %v1793_v18, %v1793_v18  ;;  %v1838_v39 = vpack.c.b16 %v1830_v16, %v1830_v16 }
 0x272   : > { %v4443_v41 = vunpack.c.l.b16 %v4436_v38 }
 0x273   : > { %v4445_v42 = vmax.f32 %v1664_v40, 0.0  ;;  %1812 = vrot.lane.b32.xlu1 %v1801_v22, %s3793_s30  ;;  %v4501_v40 = vpack.c.bf16 %v1718_v25, %v1718_v25  ;;  %v1741_v22 = vrot.slane %v4410_v62, 1 }
 0x274   : > { %v2114_v43 = vpack.c.b16 %v4443_v41, %v4440_v33 }
 0x275   : > { %v4452_v10 = vpack.c.bf16 %v4445_v42, %v4445_v42  ;;  %v1744_v47 = vrot.slane %v4445_v42, 1  ;;  %v1831_v56 = vunpack.c.l.b16 %v4501_v40  ;;  %v1757_v62 = vsel %vm1102_vm1, %v1741_v22, 0.0 }
 0x277   : > { %v1794_v44 = vunpack.c.l.b16 %v4452_v10  ;;  %v1760_v60 = vsel %vm1102_vm1, %v1744_v47, 0.0 }
 0x278   : > { %v1666_v52 = vpop.f32.mrf.mxu2  ;;  %v4474_v21 = vpack.c.bf16 %v1760_v60, %v1760_v60 }
 0x279   : > { %v1667_v53 = vadd.f32 %v1666_v52, %v4407_v51  ;;  %v1802_v54 = vpack.c.b16 %v1794_v44, %v1794_v44  ;;  %v3618_v52 = vld [vmem:[%s5030_s5 + $0x20] sm:$0xff] }
 0x27a   : > { %v4484_v13 = vunpack.c.l.b16 %v4474_v21  ;;  %2371 = vmatpush.bf16.msrb.mxu3 %v3618_v52 }
 0x27b   : > { %v4461_v58 = vmax.f32 %v1667_v53, 0.0  ;;  %1814 = vrot.lane.b32.xlu2 %v1802_v54, %s3793_s30 }
 0x27d   : > { %v4470_v1 = vpack.c.bf16 %v4461_v58, %v4461_v58  ;;  %v1745_v2 = vrot.slane %v4461_v58, 1 }
 0x27f   : > { %v1761_v23 = vsel %vm1102_vm1, %v1745_v2, 0.0  ;;  %v1795_v26 = vunpack.c.l.b16 %v4470_v1 }
 0x280   : > { %v4478_v5 = vpack.c.bf16 %v1761_v23, %v1761_v23  ;;  %v1668_v6 = vpop.f32.mrf.mxu2 }
 0x281   : > { %v1669_v8 = vadd.f32 %v1668_v6, %v4407_v51  ;;  %v1803_v48 = vpack.c.b16 %v1795_v26, %v1795_v26  ;;  %v1839_v26 = vpack.c.b16 %v1831_v56, %v1831_v56  ;;  %v4522_v6 = vpack.c.bf16 %v1757_v62, %v1757_v62 }
 0x282   : > { %v4487_v14 = vunpack.c.l.b16 %v4478_v5 }
 0x283   : > { %v1689_v15 = vmax.f32 %v1669_v8, 0.0  ;;  %1816 = vrot.lane.b32.xlu2 %v1803_v48, %s3793_s30  ;;  %v4524_v8 = vpack.c.bf16 %v1719_v29, %v1719_v29  ;;  %v1704_v48 = vrot.slane %v4445_v42, 7  ;;  %v3617_v42 = vld [vmem:[%s5030_s5 + $0x18] sm:$0xff]  ;;  %v3616_v29 = vld [vmem:[%s5030_s5 + $0x10] sm:$0xff] }
 0x284   : > { %v2118_v19 = vpack.c.b16 %v4487_v14, %v4484_v13  ;;  %2372 = vmatpush.bf16.msrb.mxu3 %v3617_v42 }
 0x285   : > { %v4495_v24 = vpack.c.bf16 %v1689_v15, %v1689_v15  ;;  %v1746_v28 = vrot.slane %v1689_v15, 1  ;;  %v1706_v25 = vrot.slane %v1689_v15, 7 }
 0x287   : > { %v1796_v30 = vunpack.c.l.b16 %v4495_v24  ;;  %v1762_v44 = vsel %vm1102_vm1, %v1746_v28, 0.0 }
 0x288   : > { %v1671_v0 = vpop.f32.mrf.mxu2  ;;  %v4516_v60 = vpack.c.bf16 %v1762_v44, %v1762_v44  ;;  %v1705_v44 = vrot.slane %v4461_v58, 7  ;;  %2373 = vmatpush.bf16.msrb.mxu3 %v3616_v29 }
 0x289   : > { %v1672_v37 = vadd.f32 %v1671_v0, %v4407_v51  ;;  %v1804_v18 = vpack.c.b16 %v1796_v30, %v1796_v30  ;;  %v1870_v30 = vunpack.c.l.b16 %v4522_v6  ;;  %v1832_v0 = vunpack.c.l.b16 %v4524_v8 }
 0x28a   : > { %v4530_v17 = vunpack.c.l.b16 %v4516_v60 }
 0x28b   : > { %v1690_v47 = vmax.f32 %v1672_v37, 0.0  ;;  %1818 = vrot.lane.b32.xlu0 %v1804_v18, %s3793_s30  ;;  %1846 = vrot.lane.b32.xlu2 %v1838_v39, %s3793_s30  ;;  %v1720_v37 = vsel %vm1005_vm0, 0.0, %v1704_v48  ;;  %v1722_v18 = vsel %vm1005_vm0, 0.0, %v1706_v25  ;;  %v1878_v39 = vpack.c.b16 %v1870_v30, %v1870_v30  ;;  %v3614_v25 = vld [vmem:[%s5030_s5] sm:$0xff] }
 0x28c   : > { %v1840_v22 = vpack.c.b16 %v1832_v0, %v1832_v0  ;;  %v4547_v59 = vpack.c.bf16 %v1720_v37, %v1720_v37  ;;  %v4553_v56 = vpack.c.bf16 %v1722_v18, %v1722_v18  ;;  %v1881_v48 = vpack.c.b16 %v4484_v13, %v4484_v13 }
 0x28d   : > { %v4511_v53 = vpack.c.bf16 %v1690_v47, %v1690_v47  ;;  %v1747_v54 = vrot.slane %v1690_v47, 1  ;;  %v1707_v62 = vrot.slane %v1690_v47, 7 }
 0x28e   : > { %v1833_v58 = vunpack.c.l.b16 %v4547_v59  ;;  %v1835_v47 = vunpack.c.l.b16 %v4553_v56 }
 0x28f   : > { %v1763_v63 = vsel %vm1102_vm1, %v1747_v54, 0.0  ;;  %v1797_v2 = vunpack.c.l.b16 %v4511_v53  ;;  %v1880_v54 = vpack.c.b16 %v4443_v41, %v4443_v41 }
 0x290   : > { %v4520_v7 = vpack.c.bf16 %v1763_v63, %v1763_v63  ;;  %v1673_v15 = vpop.f32.mrf.mxu2  ;;  %v1843_v30 = vpack.c.b16 %v1835_v47, %v1835_v47  ;;  %v1883_v47 = vpack.c.b16 %v4530_v17, %v4530_v17 }
 0x291   : > { %v1805_v23 = vpack.c.b16 %v1797_v2, %v1797_v2  ;;  %v1674_v52 = vadd.f32 %v1673_v15, %v4407_v51  ;;  %v3615_v51 = vld [vmem:[%s5030_s5 + $0x8] sm:$0xff]  ;;  %v1721_v2 = vsel %vm1005_vm0, 0.0, %v1705_v44 }
 0x292   : > { %v4533_v16 = vunpack.c.l.b16 %v4520_v7  ;;  %2374 = vmatpush.bf16.msrb.mxu3 %v3615_v51 }
 0x293   : > { %1820 = vrot.lane.b32.xlu1 %v1805_v23, %s3793_s30  ;;  %1848 = vrot.lane.b32.xlu0 %v1839_v26, %s3793_s30  ;;  %v1691_v63 = vmax.f32 %v1674_v52, 0.0  ;;  %v1723_v23 = vsel %vm1005_vm0, 0.0, %v1707_v62  ;;  %v1841_v26 = vpack.c.b16 %v1833_v58, %v1833_v58  ;;  %v1882_v52 = vpack.c.b16 %v4487_v14, %v4487_v14  ;;  %v3450_v14 = vld [vmem:[%s5032_s7 + $0x30] sm:$0xf] }
 0x294   : > { %1888 = vrot.lane.b32.xlu2 %v1879_v12, %s3793_s30  ;;  %v2122_v28 = vpack.c.b16 %v4533_v16, %v4530_v17  ;;  %v4570_v12 = vpack.c.bf16 %v1721_v2, %v1721_v2  ;;  %v4575_v0 = vpack.c.bf16 %v1723_v23, %v1723_v23  ;;  %v4794_v17 = vld [vmem:[%s5031_s6] ss:$0 sm:$0xff] }
 0x295   : > { %v1773_v42 = vrot.slane %v1691_v63, 7  ;;  %v1778_v37 = vrot.slane %v1691_v63, 1  ;;  %v4596_v23 = vpack.c.bf16 %v1691_v63, %v1691_v63 }
 0x296   : > { %v1834_v15 = vunpack.c.l.b16 %v4570_v12  ;;  %2375 = vmatpush.bf16.msrb.mxu3 %v3614_v25  ;;  %v1836_v18 = vunpack.c.l.b16 %v4575_v0  ;;  %v3629_v25 = vld [vmem:[%s5030_s5 + $0x78] sm:$0xff] }
 0x297   : > { %2397 = vmatpush.bf16.msra.mxu2 %v3629_v25 }
 0x298   : > { %v1842_v44 = vpack.c.b16 %v1834_v15, %v1834_v15  ;;  %v1844_v62 = vpack.c.b16 %v1836_v18, %v1836_v18  ;;  %v3636_v15 = vld [vmem:[%s5030_s5 + $0xb0] sm:$0xff]  ;;  %v3627_v18 = vld [vmem:[%s5030_s5 + $0x68] sm:$0xff] }
 0x29b   : > { %1886 = vrot.lane.b32.xlu1 %v1878_v39, %s3793_s30  ;;  %1850 = vrot.lane.b32.xlu0 %v1840_v22, %s3793_s30  ;;  %v1775_v39 = vsel %vm1005_vm0, 0.0, %v1773_v42  ;;  %v1780_v22 = vsel %vm1102_vm1, %v1778_v37, 0.0  ;;  %v1884_v42 = vpack.c.b16 %v4533_v16, %v4533_v16  ;;  %v3628_v37 = vld [vmem:[%s5030_s5 + $0x70] sm:$0xff] }
 0x29c   : > { %1890 = vrot.lane.b32.xlu2 %v1880_v54, %s3793_s30  ;;  %v4586_v54 = vpack.c.bf16 %v1775_v39, %v1775_v39  ;;  %v1781_v29 = vpack.c.bf16 %v1780_v22, %v1780_v22  ;;  %2398 = vmatpush.bf16.msra.mxu2 %v3628_v37  ;;  %v3794_v39 = vmov 0.0   ;;  %v3633_v37 = vld [vmem:[%s5030_s5 + $0x98] sm:$0xff] }
 0x29d   : > { %v1700_v22 = vrot.slane %v3794_v39, 7 }
 0x29e   : > { %v1837_v58 = vunpack.c.l.b16 %v4586_v54  ;;  %v4592_v51 = vunpack.c.l.b16 %v1781_v29 }
 0x2a0   : > { %v1845_v2 = vpack.c.b16 %v1837_v58, %v1837_v58  ;;  %2399 = vmatpush.bf16.msra.mxu2 %v3627_v18  ;;  %v3626_v58 = vld [vmem:[%s5030_s5 + $0x60] sm:$0xff]  ;;  %v3632_v18 = vld [vmem:[%s5030_s5 + $0x90] sm:$0xff] }
 0x2a3   : > { %1852 = vrot.lane.b32.xlu1 %v1841_v26, %s3793_s30  ;;  %1892 = vrot.lane.b32.xlu0 %v1881_v48, %s3793_s30  ;;  %v1885_v26 = vpack.c.b16 %v4592_v51, %v4592_v51  ;;  %v1903_v48 = vunpack.c.l.b16 %v4596_v23 }
 0x2a4   : > { %1856 = vrot.lane.b32.xlu2 %v1843_v30, %s3793_s30  ;;  %v3637_v30 = vld [vmem:[%s5030_s5 + $0xb8] sm:$0xff]  ;;  %2400 = vmatpush.bf16.msra.mxu2 %v3626_v58 }
 0x2a5   : > { %v1904_v63 = vpack.c.b16 %v1903_v48, %v1903_v48  ;;  %2426 = vmatpush.bf16.msra.mxu3 %v3637_v30 }
 0x2a9   : > { %2427 = vmatpush.bf16.msra.mxu3 %v3636_v15 }
 0x2ab   : > { %1854 = vrot.lane.b32.xlu1 %v1842_v44, %s3793_s30  ;;  %1894 = vrot.lane.b32.xlu0 %v1882_v52, %s3793_s30  ;;  %v1807_v44 = vpop.permute.xlu0 %1806  ;;  %v3635_v52 = vld [vmem:[%s5030_s5 + $0xa8] sm:$0xff] }
 0x2ac   : > { %1858 = vrot.lane.b32.xlu2 %v1844_v62, %s3793_s30  ;;  %v1716_v62 = vsel %vm1005_vm0, 0.0, %v1700_v22  ;;  %v3623_v22 = vld [vmem:[%s5030_s5 + $0x48] sm:$0xff] }
 0x2ad   : > { %2428 = vmatpush.bf16.msra.mxu3 %v3635_v52  ;;  %v1724_v29 = vpack.c.bf16 %v1716_v62, %v1716_v62 }
 0x2b3   : > { %1896 = vrot.lane.b32.xlu1 %v1883_v47, %s3793_s30  ;;  %1860 = vrot.lane.b32.xlu0 %v1845_v2, %s3793_s30  ;;  %v3634_v47 = vld [vmem:[%s5030_s5 + $0xa0] sm:$0xff]  ;;  %v4634_v2 = vsel %vm1576_vm7, %v1724_v29, %v1807_v44 }
 0x2b4   : > { %1900 = vrot.lane.b32.xlu2 %v1885_v26, %s3793_s30  ;;  %2429 = vmatpush.bf16.msra.mxu3 %v3634_v47  ;;  %v2008_v25 = vunpack.c.l.b16 %v4634_v2 }
 0x2b8   : > { %2430 = vmatpush.bf16.msra.mxu3 %v3633_v37 }
 0x2bb   : > { %1898 = vrot.lane.b32.xlu1 %v1884_v42, %s3793_s30  ;;  %1905 = vrot.lane.b32.xlu0 %v1904_v63, %s3793_s30  ;;  %v3625_v63 = vld [vmem:[%s5030_s5 + $0x58] sm:$0xff]  ;;  %s432_s30 = scalar_lea.vmem [#allocation2], %s431_s25 }
 0x2bc   : > { %2401 = vmatpush.bf16.msra.mxu2 %v3625_v63  ;;  %2431 = vmatpush.bf16.msra.mxu3 %v3632_v18  ;;  %s2961_s20 = sshll.u32 %s432_s30, 4  ;;  %s2962_s20 = int_to_ptr.vmem [resolvable:$true] %s2961_s20 }
 0x2d5   : > { %v1809_v26 = vpop.permute.xlu0 %1808  ;;  %v1815_v52 = vpop.permute.xlu2 %1814 }
 0x2d6   : > { %v1912_v48 = vsel %vm1576_vm7, %v4481_v55, %v1809_v26  ;;  %v3624_v55 = vld [vmem:[%s5030_s5 + $0x50] sm:$0xff]  ;;  %v3622_v26 = vld [vmem:[%s5030_s5 + $0x40] sm:$0xff] }
 0x2d7   : > { %v2012_v42 = vunpack.c.l.b16 %v1912_v48  ;;  %2402 = vmatpush.bf16.msra.mxu2 %v3624_v55  ;;  %v3645_v55 = vld [vmem:[%s5030_s5 + $0xf8] sm:$0xff] }
 0x2d9   : > { %v2110_v30 = vpack.c.b16 %v2012_v42, %v2008_v25 }
 0x2db   : > { %2376 = vmatmul.bf16.vlgmr.msrb.gmra.mxu3 %v2110_v30  ;;  %2403 = vmatpush.bf16.msra.mxu2 %v3623_v22  ;;  %v1921_v30 = vsel %vm1576_vm7, %v4547_v59, %v1815_v52  ;;  %v1740_v22 = vrot.slane %v3794_v39, 1  ;;  %v3644_v52 = vld [vmem:[%s5030_s5 + $0xf0] sm:$0xff] }
 0x2dd   : > { %v1811_v15 = vpop.permute.xlu1 %1810  ;;  %v1817_v42 = vpop.permute.xlu2 %1816  ;;  %v1756_v59 = vsel %vm1102_vm1, %v1740_v22, 0.0 }
 0x2de   : > { %v1915_v44 = vsel %vm1576_vm7, %v4501_v40, %v1811_v15  ;;  %v3631_v40 = vld [vmem:[%s5030_s5 + $0x88] sm:$0xff]  ;;  %v1924_v63 = vsel %vm1576_vm7, %v4570_v12, %v1817_v42  ;;  %v2018_v15 = vunpack.c.l.b16 %v1921_v30  ;;  %v3649_v12 = vld [vmem:[%s5030_s5 + $0x118] sm:$0xff] }
 0x2df   : > { %v2011_v58 = vunpack.c.l.b16 %v1915_v44  ;;  %2404 = vmatpush.bf16.msra.mxu2 %v3622_v26  ;;  %2432 = vmatpush.bf16.msra.mxu3 %v3631_v40  ;;  %v2021_v37 = vunpack.c.l.b16 %v1924_v63 }
 0x2e1   : > { %v4679_v18 = vpack.c.b16 %v2021_v37, %v2018_v15  ;;  %v3643_v15 = vld [vmem:[%s5030_s5 + $0xe8] sm:$0xff] }
 0x2e3   : > { %2455 = vmatpush.bf16.msrb.mxu2 %v3645_v55 }
 0x2e5   : > { %v1813_v62 = vpop.permute.xlu1 %1812 }
 0x2e6   : > { %v1918_v29 = vsel %vm1576_vm7, %v4524_v8, %v1813_v62  ;;  %v3630_v8 = vld [vmem:[%s5030_s5 + $0x80] sm:$0xff]  ;;  %v1847_v62 = vpop.permute.xlu2 %1846 }
 0x2e7   : > { %v2015_v47 = vunpack.c.l.b16 %v1918_v29  ;;  %2433 = vmatpush.bf16.msra.mxu3 %v3630_v8  ;;  %2456 = vmatpush.bf16.msrb.mxu2 %v3644_v52  ;;  %v4689_v29 = vpack.c.bf16 %v1756_v59, %v1756_v59  ;;  %v3641_v59 = vld [vmem:[%s5030_s5 + $0xd8] sm:$0xff] }
 0x2e9   : > { %v4663_v48 = vpack.c.b16 %v2015_v47, %v2011_v58  ;;  %v1933_v39 = vsel %vm1576_vm7, %v4689_v29, %v1847_v62 }
 0x2ea   : > { %v2009_v8 = vunpack.c.l.b16 %v1933_v39 }
 0x2eb   : > { %2381 = vmatmul.bf16.gmra.mxu3 %v4663_v48  ;;  %2457 = vmatpush.bf16.msrb.mxu2 %v3643_v15 }
 0x2ec   : > { %2488 = vmatpush.bf16.msrb.mxu3 %v3649_v12  ;;  %v3642_v12 = vld [vmem:[%s5030_s5 + $0xe0] sm:$0xff] }
 0x2ef   : > { %2458 = vmatpush.bf16.msrb.mxu2 %v3642_v12 }
 0x2f3   : > { %2459 = vmatpush.bf16.msrb.mxu2 %v3641_v59 }
 0x2fb   : > { %2386 = vmatmul.bf16.gmra.mxu3 %v4679_v18 }
 0x2fd   : > { %v1819_v44 = vpop.permute.xlu0 %1818 }
 0x2fe   : > { %v1927_v58 = vsel %vm1576_vm7, %v4553_v56, %v1819_v44  ;;  %v3648_v56 = vld [vmem:[%s5030_s5 + $0x110] sm:$0xff] }
 0x2ff   : > { %v2024_v63 = vunpack.c.l.b16 %v1927_v58  ;;  %2489 = vmatpush.bf16.msrb.mxu3 %v3648_v56  ;;  %v3638_v56 = vld [vmem:[%s5030_s5 + $0xc0] sm:$0xff] }
 0x305   : > { %v1821_v47 = vpop.permute.xlu1 %1820  ;;  %v1849_v26 = vpop.permute.xlu0 %1848 }
 0x306   : > { %v1930_v40 = vsel %vm1576_vm7, %v4575_v0, %v1821_v47  ;;  %v1936_v42 = vsel %vm1576_vm7, %v4522_v6, %v1849_v26  ;;  %v1889_v6 = vpop.permute.xlu2 %1888 }
 0x307   : > { %v2027_v30 = vunpack.c.l.b16 %v1930_v40  ;;  %v2013_v37 = vunpack.c.l.b16 %v1936_v42  ;;  %v1960_v62 = vsel %vm1576_vm7, %v4419_v31, %v1889_v6  ;;  %v3640_v31 = vld [vmem:[%s5030_s5 + $0xd0] sm:$0xff] }
 0x308   : > { %v2014_v40 = vunpack.c.l.b16 %v1960_v62  ;;  %2460 = vmatpush.bf16.msrb.mxu2 %v3640_v31 }
 0x309   : > { %v2111_v55 = vpack.c.b16 %v2013_v37, %v2009_v8  ;;  %v4702_v22 = vpack.c.b16 %v2027_v30, %v2024_v63 }
 0x30b   : > { %2391 = vmatmul.bf16.gmra.mxu3 %v4702_v22  ;;  %2405 = vmatmul.bf16.vlgmr.msra.gmra.mxu2 %v2111_v55 }
 0x30d   : > { %v1887_v0 = vpop.permute.xlu1 %1886  ;;  %v1851_v44 = vpop.permute.xlu0 %1850 }
 0x30e   : > { %v1957_v52 = vsel %vm1576_vm7, %v4414_v11, %v1887_v0  ;;  %v1939_v39 = vsel %vm1576_vm7, %v4432_v32, %v1851_v44  ;;  %v1891_v42 = vpop.permute.xlu2 %1890  ;;  %v3647_v11 = vld [vmem:[%s5030_s5 + $0x108] sm:$0xff] }
 0x30f   : > { %v2010_v58 = vunpack.c.l.b16 %v1957_v52  ;;  %v2016_v8 = vunpack.c.l.b16 %v1939_v39  ;;  %2490 = vmatpush.bf16.msrb.mxu3 %v3647_v11  ;;  %v3639_v32 = vld [vmem:[%s5030_s5 + $0xc8] sm:$0xff]  ;;  %v1963_v12 = vsel %vm1576_vm7, %v4429_v57, %v1891_v42 }
 0x310   : > { %2461 = vmatpush.bf16.msrb.mxu2 %v3639_v32  ;;  %v2017_v39 = vunpack.c.l.b16 %v1963_v12 }
 0x311   : > { %v2112_v30 = vpack.c.b16 %v2014_v40, %v2010_v58 }
 0x314   : > { %2462 = vmatpush.bf16.msrb.mxu2 %v3638_v56 }
 0x315   : > { %v1853_v47 = vpop.permute.xlu1 %1852  ;;  %v1893_v15 = vpop.permute.xlu0 %1892 }
 0x316   : > { %v1942_v26 = vsel %vm1576_vm7, %v4436_v38, %v1853_v47  ;;  %v1857_v55 = vpop.permute.xlu2 %1856  ;;  %v1966_v6 = vsel %vm1576_vm7, %v4452_v10, %v1893_v15  ;;  %v3646_v10 = vld [vmem:[%s5030_s5 + $0x100] sm:$0xff] }
 0x317   : > { %v2019_v63 = vunpack.c.l.b16 %v1942_v26  ;;  %v1948_v44 = vsel %vm1576_vm7, %v4478_v5, %v1857_v55  ;;  %v2020_v59 = vunpack.c.l.b16 %v1966_v6  ;;  %2491 = vmatpush.bf16.msrb.mxu3 %v3646_v10 }
 0x318   : > { %v2025_v58 = vunpack.c.l.b16 %v1948_v44 }
 0x319   : > { %v2115_v37 = vpack.c.b16 %v2019_v63, %v2016_v8  ;;  %v2116_v26 = vpack.c.b16 %v2020_v59, %v2017_v39  ;;  %v3452_v59 = vld [vmem:[%s5032_s7 + $0x38] sm:$0xf0]  ;;  %v3442_v39 = vld [vmem:[%s5032_s7 + $0x20] sm:$0xf] }
 0x31b   : > { %2410 = vmatmul.bf16.gmra.mxu2 %v2115_v37  ;;  %2434 = vmatmul.bf16.vlgmr.msra.gmra.mxu3 %v2112_v30 }
 0x31d   : > { %v1855_v38 = vpop.permute.xlu1 %1854  ;;  %v1895_v62 = vpop.permute.xlu0 %1894 }
 0x31e   : > { %v1945_v0 = vsel %vm1576_vm7, %v4474_v21, %v1855_v38  ;;  %v1859_v40 = vpop.permute.xlu2 %1858  ;;  %v1969_v63 = vsel %vm1576_vm7, %v4470_v1, %v1895_v62  ;;  %v4758_v1 = vpop.f32.mrf.mxu3 }
 0x31f   : > { %v2022_v52 = vunpack.c.l.b16 %v1945_v0  ;;  %v1951_v8 = vsel %vm1576_vm7, %v4516_v60, %v1859_v40  ;;  %v2023_v11 = vunpack.c.l.b16 %v1969_v63 }
 0x320   : > { %v2028_v15 = vunpack.c.l.b16 %v1951_v8  ;;  %v3665_v8 = vld [vmem:[%s5034_s9 + $0x38] sm:$0xff] }
 0x321   : > { %v2119_v47 = vpack.c.b16 %v2025_v58, %v2022_v52  ;;  %v3655_v58 = vld [vmem:[%s5032_s7 + $0x24] sm:$0xf0]  ;;  %2868 = vmatpush.bf16.msrb.mxu0 %v3665_v8 }
 0x322   : > { %v3671_v8 = vld [vmem:[%s5034_s9 + $0x68] sm:$0xff] }
 0x325   : > { %v1897_v21 = vpop.permute.xlu1 %1896  ;;  %v1861_v57 = vpop.permute.xlu0 %1860 }
 0x326   : > { %v1972_v5 = vsel %vm1576_vm7, %v4495_v24, %v1897_v21  ;;  %v1954_v42 = vsel %vm1576_vm7, %v4520_v7, %v1861_v57  ;;  %v1901_v55 = vpop.permute.xlu2 %1900 }
 0x327   : > { %v2026_v30 = vunpack.c.l.b16 %v1972_v5  ;;  %v2031_v37 = vunpack.c.l.b16 %v1954_v42  ;;  %v1978_v7 = vsel %vm1576_vm7, %v4596_v23, %v1901_v55  ;;  %v3654_v5 = vld [vmem:[%s5032_s7 + $0x24] sm:$0xf]  ;;  %v3444_v42 = vld [vmem:[%s5032_s7 + $0x28] sm:$0xf0] }
 0x328   : > { %v2032_v56 = vunpack.c.l.b16 %v1978_v7  ;;  %v3447_v63 = vor.u32 %v3654_v5, %v3444_v42  ;;  %v3663_v42 = vld [vmem:[%s5034_s9 + $0x28] sm:$0xff] }
 0x329   : > { %v2123_v31 = vpack.c.b16 %v2031_v37, %v2028_v15  ;;  %v2120_v32 = vpack.c.b16 %v2026_v30, %v2023_v11  ;;  %v3673_v30 = vld [vmem:[%s5034_s9 + $0x78] sm:$0xff]  ;;  %v3434_v11 = vld [vmem:[%s5032_s7 + $0x10] sm:$0xf] }
 0x32a   : > { %2881 = vmatpush.bf16.msrb.mxu1 %v3673_v30 }
 0x32b   : > { %2415 = vmatmul.bf16.gmra.mxu2 %v2119_v47  ;;  %2439 = vmatmul.bf16.gmra.mxu3 %v2116_v26  ;;  %v3443_v47 = vor.u32 %v3655_v58, %v3442_v39 }
 0x32d   : > { %v1899_v38 = vpop.permute.xlu1 %1898 }
 0x32e   : > { %v1975_v24 = vsel %vm1576_vm7, %v4511_v53, %v1899_v38 }
 0x32f   : > { %v2029_v60 = vunpack.c.l.b16 %v1975_v24 }
 0x331   : > { %v2124_v6 = vpack.c.b16 %v2032_v56, %v2029_v60  ;;  %v3652_v56 = vld [vmem:[%s5032_s7 + $0x14] sm:$0xf] }
 0x33b   : > { %2420 = vmatmul.bf16.gmra.mxu2 %v2123_v31  ;;  %2444 = vmatmul.bf16.gmra.mxu3 %v2120_v32  ;;  %v3653_v31 = vld [vmem:[%s5032_s7 + $0x14] sm:$0xf0] }
 0x33c   : > { %v3435_v32 = vor.u32 %v3653_v31, %v3434_v11 }
 0x34b   : > { %2449 = vmatmul.bf16.gmra.mxu3 %v2124_v6  ;;  %2463 = vmatmul.bf16.vlgmr.msrb.gmra.mxu2 %v4663_v48  ;;  %v1906_v48 = vpop.permute.xlu0 %1905  ;;  %v3436_v6 = vld [vmem:[%s5032_s7 + $0x18] sm:$0xf0] }
 0x35b   : > { %2468 = vmatmul.bf16.gmra.mxu2 %v4679_v18  ;;  %3420 = vmatmul.msk.bf16.vlgmr.msrb.gmra.mxu3 %vm1576_vm7, %v2114_v43  ;;  %v1981_v18 = vsel %vm1576_vm7, %v4586_v54, %v1906_v48  ;;  %v2033_v43 = vunpack.c.l.b16 %v4689_v29 }
 0x35c   : > { %v2030_v12 = vunpack.c.l.b16 %v1981_v18  ;;  %v3426_v18 = vld [vmem:[%s5032_s7] sm:$0xf] }
 0x35d   : > { %v2126_v16 = vpack.c.b16 %v2033_v43, %v4592_v51 }
 0x35e   : > { %v2377_v0 = vpop.f32.mrf.mxu3  ;;  %v2125_v33 = vpack.c.b16 %v2008_v25, %v2030_v12  ;;  %v3651_v12 = vld [vmem:[%s5032_s7 + $0x4] sm:$0xf0] }
 0x366   : > { %v4765_v53 = vpop.f32.mrf.mxu3 }
 0x36b   : > { %2473 = vmatmul.bf16.gmra.mxu2 %v4702_v22  ;;  %3421 = vmatmul.msk.bf16.gmra.mxu3 %vm1576_vm7, %v2118_v19  ;;  %v3657_v19 = vld [vmem:[%s5032_s7 + $0x34] sm:$0xf0]  ;;  %v3656_v22 = vld [vmem:[%s5032_s7 + $0x34] sm:$0xf] }
 0x36c   : > { %v3451_v54 = vor.u32 %v3657_v19, %v3450_v14  ;;  %v3455_v52 = vor.u32 %v3656_v22, %v3452_v59 }
 0x36e   : > { %v2382_v23 = vpop.f32.mrf.mxu3  ;;  %2595 = vmatpush.bf16.msra.mxu2 %v3451_v54  ;;  %2624 = vmatpush.bf16.msra.mxu3 %v3455_v52 }
 0x36f   : > { %v2383_v26 = vadd.f32 %v4794_v17, %v2382_v23 }
 0x372   : > { %2596 = vmatpush.bf16.msra.mxu2 %v3443_v47  ;;  %2625 = vmatpush.bf16.msra.mxu3 %v3447_v63 }
 0x376   : > { %v4774_v44 = vpop.f32.mrf.mxu3  ;;  %2597 = vmatpush.bf16.msra.mxu2 %v3435_v32 }
 0x37b   : > { %2478 = vmatmul.bf16.gmra.mxu2 %v2125_v33  ;;  %3422 = vmatmul.msk.bf16.gmra.mxu3 %vm1576_vm7, %v2122_v28  ;;  %v2378_v28 = vadd.f32 %v4794_v17, %v2377_v0  ;;  %v3439_v0 = vor.u32 %v3652_v56, %v3436_v6  ;;  %v3427_v33 = vor.u32 %v3651_v12, %v3426_v18 }
 0x37c   : > { %v2385_v56 = vadd.f32 %v4794_v17, %v4774_v44  ;;  %v3662_v44 = vld [vmem:[%s5034_s9 + $0x20] sm:$0xff] }
 0x37d   : > { %2626 = vmatpush.bf16.msra.mxu3 %v3439_v0  ;;  %2598 = vmatpush.bf16.msra.mxu2 %v3427_v33 }
 0x37e   : > { %v2387_v41 = vpop.f32.mrf.mxu3 }
 0x37f   : > { %v2388_v38 = vadd.f32 %v4794_v17, %v2387_v41 }
 0x386   : > { %v4783_v13 = vpop.f32.mrf.mxu3 }
 0x38b   : > { %3423 = vmatmul.msk.bf16.gmra.mxu3 %vm1576_vm7, %v2126_v16  ;;  %v3650_v16 = vld [vmem:[%s5032_s7 + $0x4] sm:$0xf] }
 0x38e   : > { %v2392_v2 = vpop.f32.mrf.mxu3  ;;  %v2406_v25 = vpop.f32.mrf.mxu2 }
 0x38f   : > { %v2407_v29 = vadd.f32 %v2406_v25, %v2378_v28  ;;  %v2393_v41 = vadd.f32 %v4794_v17, %v2392_v2  ;;  %v3428_v28 = vld [vmem:[%s5032_s7 + $0x8] sm:$0xf0]  ;;  %v3664_v25 = vld [vmem:[%s5034_s9 + $0x30] sm:$0xff] }
 0x390   : > { %v3672_v2 = vld [vmem:[%s5034_s9 + $0x70] sm:$0xff]  ;;  %2869 = vmatpush.bf16.msrb.mxu0 %v3664_v25  ;;  %v3669_v25 = vld [vmem:[%s5034_s9 + $0x58] sm:$0xff] }
 0x391   : > { %2882 = vmatpush.bf16.msrb.mxu1 %v3672_v2 }
 0x394   : > { %2870 = vmatpush.bf16.msrb.mxu0 %v3663_v42 }
 0x395   : > { %2883 = vmatpush.bf16.msrb.mxu1 %v3671_v8 }
 0x396   : > { %v4805_v62 = vpop.f32.mrf.mxu3  ;;  %v2408_v51 = vpop.f32.mrf.mxu2 }
 0x397   : > { %v2395_v8 = vadd.f32 %v4794_v17, %v4805_v62  ;;  %v3667_v62 = vld [vmem:[%s5034_s9 + $0x48] sm:$0xff] }
 0x398   : > { %2871 = vmatpush.bf16.msrb.mxu0 %v3662_v44  ;;  %v2650_v44 = vunpack.c.h.bf16 %v4307_v45 }
 0x39e   : > { %v2411_v10 = vpop.f32.mrf.mxu2  ;;  %v2435_v21 = vpop.f32.mrf.mxu3 }
 0x39f   : > { %v2412_v57 = vadd.f32 %v2411_v10, %v2383_v26  ;;  %v2436_v40 = vadd.f32 %v2435_v21, %v2407_v29  ;;  %v3431_v29 = vor.u32 %v3650_v16, %v3428_v28  ;;  %v2380_v21 = vadd.f32 %v4794_v17, %v4765_v53  ;;  %v3661_v28 = vld [vmem:[%s5034_s9 + $0x18] sm:$0xff] }
 0x3a0   : > { %v2390_v16 = vadd.f32 %v4794_v17, %v4783_v13  ;;  %2872 = vmatpush.bf16.msrb.mxu0 %v3661_v28  ;;  %v3660_v13 = vld [vmem:[%s5034_s9 + $0x10] sm:$0xff]  ;;  %v3659_v17 = vld [vmem:[%s5034_s9 + $0x8] sm:$0xff] }
 0x3a1   : > { %2627 = vmatpush.bf16.msra.mxu3 %v3431_v29  ;;  %v2409_v5 = vadd.f32 %v2408_v51, %v2380_v21 }
 0x3a4   : > { %2873 = vmatpush.bf16.msrb.mxu0 %v3660_v13 }
 0x3a6   : > { %v4826_v37 = vpop.f32.mrf.mxu2  ;;  %v2437_v15 = vpop.f32.mrf.mxu3 }
 0x3a7   : > { %v2438_v63 = vadd.f32 %v2437_v15, %v2409_v5 }
 0x3a8   : > { %2874 = vmatpush.bf16.msrb.mxu0 %v3659_v17  ;;  %v2657_v17 = vunpack.c.l.bf16 %v4393_v3 }
 0x3ae   : > { %v2416_v55 = vpop.f32.mrf.mxu2  ;;  %v2440_v24 = vpop.f32.mrf.mxu3 }
 0x3af   : > { %v2417_v7 = vadd.f32 %v2416_v55, %v2388_v38  ;;  %v2441_v60 = vadd.f32 %v2440_v24, %v2412_v57 }
 0x3b6   : > { %v4841_v23 = vpop.f32.mrf.mxu2  ;;  %v2442_v48 = vpop.f32.mrf.mxu3 }
 0x3b7   : > { %v2419_v29 = vadd.f32 %v4841_v23, %v2390_v16 }
 0x3be   : > { %v2421_v43 = vpop.f32.mrf.mxu2  ;;  %v2445_v14 = vpop.f32.mrf.mxu3 }
 0x3bf   : > { %v2422_v19 = vadd.f32 %v2421_v43, %v2393_v41  ;;  %v2446_v54 = vadd.f32 %v2445_v14, %v2417_v7 }
 0x3c6   : > { %v4862_v22 = vpop.f32.mrf.mxu2  ;;  %v2447_v59 = vpop.f32.mrf.mxu3 }
 0x3c7   : > { %v2448_v2 = vadd.f32 %v2447_v59, %v2419_v29 }
 0x3ce   : > { %v2450_v52 = vpop.f32.mrf.mxu3  ;;  %v2464_v39 = vpop.f32.mrf.mxu2 }
 0x3cf   : > { %v4864_v58 = vadd.f32 %v2450_v52, %v2422_v19  ;;  %v2465_v30 = vadd.f32 %v2464_v39, %v2436_v40  ;;  %v2414_v40 = vadd.f32 %v4826_v37, %v2385_v56  ;;  %v3670_v37 = vld [vmem:[%s5034_s9 + $0x60] sm:$0xff]  ;;  %v3668_v39 = vld [vmem:[%s5034_s9 + $0x50] sm:$0xff]  ;;  %v1630_v56 = vadd.f32 %v4369_v27, %v4302_v36 }
 0x3d0   : > { %2884 = vmatpush.bf16.msrb.mxu1 %v3670_v37 }
 0x3d1   : > { %v2443_v15 = vadd.f32 %v2442_v48, %v2414_v40  ;;  %v2533_v40 = vld [vmem:[%s5033_s8] sm:$0x3] }
 0x3d4   : > { %2885 = vmatpush.bf16.msrb.mxu1 %v3669_v25  ;;  %v2653_v25 = vunpack.c.l.bf16 %v4378_v61 }
 0x3d6   : > { %v4866_v47 = vpop.f32.mrf.mxu3  ;;  %v2466_v26 = vpop.f32.mrf.mxu2 }
 0x3d7   : > { %v2467_v11 = vadd.f32 %v2466_v26, %v2438_v63  ;;  %v2424_v63 = vadd.f32 %v4862_v22, %v2395_v8 }
 0x3d8   : > { %2886 = vmatpush.bf16.msrb.mxu1 %v3668_v39 }
 0x3dc   : > { %2887 = vmatpush.bf16.msrb.mxu1 %v3667_v62 }
 0x3de   : > { %v2493_v10 = vpop.f32.mrf.mxu3  ;;  %v2469_v57 = vpop.f32.mrf.mxu2 }
 0x3df   : > { %v2494_v31 = vadd.f32 %v2493_v10, %v2465_v30  ;;  %v2470_v6 = vadd.f32 %v2469_v57, %v2441_v60 }
 0x3e1   : > { %v2513_v55 = vmax.f32 %v2494_v31, 0.0 }
 0x3e6   : > { %v2495_v32 = vpop.f32.mrf.mxu3  ;;  %v2471_v24 = vpop.f32.mrf.mxu2 }
 0x3e7   : > { %v2496_v38 = vadd.f32 %v2495_v32, %v2467_v11  ;;  %v2472_v18 = vadd.f32 %v2471_v24, %v2443_v15  ;;  %v2453_v11 = vadd.f32 %v4866_v47, %v2424_v63  ;;  %v1601_v47 = vadd.f32 %v4367_v46, %v4299_v35 }
 0x3e9   : > { %v2514_v53 = vmax.f32 %v2496_v38, 0.0  ;;  %v1677_v15 = vpack.c.bf16 %v1630_v56, %v1601_v47 }
 0x3eb   : > { %v2521_v51 = vpack.c.bf16 %v2514_v53, %v2513_v55  ;;  %v2651_v27 = vunpack.c.l.bf16 %v1677_v15 }
 0x3ed   : > { %3456 = vmatmul.msk.bf16.vlgmr.msra.gmra.mxu2 %vm1576_vm7, %v2521_v51  ;;  %3460 = vmatmul.msk.bf16.vlgmr.msra.gmra.mxu3 %vm1576_vm7, %v2521_v51 }
 0x3ee   : > { %v2498_v7 = vpop.f32.mrf.mxu3  ;;  %v2474_v0 = vpop.f32.mrf.mxu2 }
 0x3ef   : > { %v2499_v12 = vadd.f32 %v2498_v7, %v2470_v6  ;;  %v2475_v52 = vadd.f32 %v2474_v0, %v2446_v54  ;;  %v4926_v6 = vperm.slane %v2533_v40, 0  ;;  %v4928_v0 = vperm.slane %v2533_v40, 1 }
 0x3f1   : > { %v2515_v43 = vmax.f32 %v2499_v12, 0.0 }
 0x3f6   : > { %v2500_v33 = vpop.f32.mrf.mxu3  ;;  %v2476_v60 = vpop.f32.mrf.mxu2 }
 0x3f7   : > { %v2501_v41 = vadd.f32 %v2500_v33, %v2472_v18  ;;  %v2477_v26 = vadd.f32 %v2476_v60, %v2448_v2  ;;  %v2654_v2 = vunpack.c.h.bf16 %v4378_v61 }
 0x3f9   : > { %v2516_v14 = vmax.f32 %v2501_v41, 0.0 }
 0x3fb   : > { %v2522_v19 = vpack.c.bf16 %v2516_v14, %v2515_v43  ;;  %v2652_v14 = vunpack.c.h.bf16 %v1677_v15  ;;  %v1611_v15 = vadd.f32 %v4396_v34, %v4299_v35 }
 0x3fd   : > { %3457 = vmatmul.msk.bf16.gmra.mxu2 %vm1576_vm7, %v2522_v19  ;;  %3461 = vmatmul.msk.bf16.gmra.mxu3 %vm1576_vm7, %v2522_v19  ;;  %v2649_v19 = vunpack.c.l.bf16 %v4307_v45  ;;  %v1635_v45 = vadd.f32 %v4388_v20, %v4302_v36 }
 0x3fe   : > { %v2503_v48 = vpop.f32.mrf.mxu3  ;;  %v2479_v5 = vpop.f32.mrf.mxu2 }
 0x3ff   : > { %v2504_v10 = vadd.f32 %v2503_v48, %v2475_v52  ;;  %v2480_v31 = vadd.f32 %v2479_v5, %v4864_v58 }
 0x401   : > { %v2517_v23 = vmax.f32 %v2504_v10, 0.0  ;;  %v1606_v10 = vadd.f32 %v4386_v50, %v4299_v35  ;;  %v3666_v50 = vld [vmem:[%s5034_s9 + $0x40] sm:$0xff] }
 0x402   : > { %2888 = vmatpush.bf16.msrb.mxu1 %v3666_v50 }
 0x403   : > { %v1679_v8 = vpack.c.bf16 %v1635_v45, %v1606_v10 }
 0x406   : > { %v2505_v21 = vpop.f32.mrf.mxu3  ;;  %v2481_v30 = vpop.f32.mrf.mxu2 }
 0x407   : > { %v2506_v57 = vadd.f32 %v2505_v21, %v2477_v26  ;;  %v2482_v32 = vadd.f32 %v2481_v30, %v2453_v11  ;;  %v3658_v11 = vld [vmem:[%s5034_s9] sm:$0xff] }
 0x408   : > { %2875 = vmatpush.bf16.msrb.mxu0 %v3658_v11 }
 0x409   : > { %v2518_v59 = vmax.f32 %v2506_v57, 0.0 }
 0x40b   : > { %v2523_v54 = vpack.c.bf16 %v2518_v59, %v2517_v23 }
 0x40d   : > { %3458 = vmatmul.msk.bf16.gmra.mxu2 %vm1576_vm7, %v2523_v54  ;;  %3462 = vmatmul.msk.bf16.gmra.mxu3 %vm1576_vm7, %v2523_v54 }
 0x40e   : > { %v2508_v42 = vpop.f32.mrf.mxu3 }
 0x40f   : > { %v2509_v38 = vadd.f32 %v2508_v42, %v2480_v31 }
 0x411   : > { %v2519_v24 = vmax.f32 %v2509_v38, 0.0 }
 0x416   : > { %v2510_v55 = vpop.f32.mrf.mxu3 }
 0x417   : > { %v2511_v53 = vadd.f32 %v2510_v55, %v2482_v32  ;;  %v2655_v55 = vunpack.c.l.bf16 %v1679_v8 }
 0x419   : > { %v2520_v51 = vmax.f32 %v2511_v53, 0.0  ;;  %v2656_v53 = vunpack.c.h.bf16 %v1679_v8 }
 0x41b   : > { %v2524_v7 = vpack.c.bf16 %v2520_v51, %v2519_v24 }
 0x41d   : > { %3459 = vmatmul.msk.bf16.gmra.mxu2 %vm1576_vm7, %v2524_v7  ;;  %3463 = vmatmul.msk.bf16.gmra.mxu3 %vm1576_vm7, %v2524_v7 }
 0x470   : > { %v2600_v22 = vpop.f32.mrf.mxu2  ;;  %v2629_v58 = vpop.f32.mrf.mxu3 }
 0x471   : > { %v2601_v46 = vadd.f32 %v2600_v22, %v4926_v6  ;;  %v2630_v43 = vadd.f32 %v2629_v58, %v4928_v0  ;;  %v2658_v22 = vunpack.c.h.bf16 %v4393_v3 }
 0x473   : > { %v2665_v48 = vadd.f32 %v2649_v19, %v2601_v46  ;;  %v2666_v16 = vadd.f32 %v2650_v44, %v2630_v43 }
 0x475   : > { %v2681_v21 = vmax.f32 %v2665_v48, 0.0  ;;  %v2682_v57 = vmax.f32 %v2666_v16, 0.0 }
 0x478   : > { %v2602_v18 = vpop.f32.mrf.mxu2  ;;  %v2631_v12 = vpop.f32.mrf.mxu3 }
 0x479   : > { %v2603_v33 = vadd.f32 %v2602_v18, %v4926_v6  ;;  %v2632_v41 = vadd.f32 %v2631_v12, %v4928_v0  ;;  %v1640_v18 = vadd.f32 %v4398_v4, %v4302_v36  ;;  %v2661_v4 = vunpack.c.l.bf16 %v4402_v9 }
 0x47b   : > { %v2667_v37 = vadd.f32 %v2651_v27, %v2603_v33  ;;  %v2668_v60 = vadd.f32 %v2652_v14, %v2632_v41  ;;  %v1681_v14 = vpack.c.bf16 %v1640_v18, %v1611_v15 }
 0x47d   : > { %v2683_v52 = vmax.f32 %v2667_v37, 0.0  ;;  %v2684_v13 = vmax.f32 %v2668_v60, 0.0  ;;  %v2659_v16 = vunpack.c.l.bf16 %v1681_v14  ;;  %v2660_v34 = vunpack.c.h.bf16 %v1681_v14 }
 0x47f   : > { %v2697_v59 = vadd.f32 %v2683_v52, %v2681_v21  ;;  %v2710_v54 = vadd.f32 %v2684_v13, %v2682_v57 }
 0x480   : > { %v2605_v28 = vpop.f32.mrf.mxu2  ;;  %v2634_v29 = vpop.f32.mrf.mxu3 }
 0x481   : > { %v2606_v39 = vadd.f32 %v2605_v28, %v4926_v6  ;;  %v2635_v26 = vadd.f32 %v2634_v29, %v4928_v0  ;;  %v1616_v29 = vadd.f32 %v4404_v49, %v4299_v35 }
 0x483   : > { %v2669_v5 = vadd.f32 %v2653_v25, %v2606_v39  ;;  %v2670_v23 = vadd.f32 %v2654_v2, %v2635_v26  ;;  %v1645_v2 = vadd.f32 %v4758_v1, %v4302_v36  ;;  %v2662_v39 = vunpack.c.h.bf16 %v4402_v9  ;;  %v3676_v36 = vld [vmem:[%s5036_s11 + $0x10] sm:$0xff] }
 0x484   : > { %v3795_v26 = vmov 64.0  }
 0x485   : > { %v2685_v42 = vmax.f32 %v2669_v5, 0.0  ;;  %v2686_v61 = vmax.f32 %v2670_v23, 0.0  ;;  %3725 = vrcp.f32 %v3795_v26  ;;  %v3677_v5 = vld [vmem:[%s5036_s11 + $0x18] sm:$0xff]  ;;  %v1683_v9 = vpack.c.bf16 %v1645_v2, %v1616_v29 }
 0x486   : > { %2939 = vmatpush.bf16.msra.mxu0 %v3677_v5 }
 0x487   : > { %v2698_v63 = vadd.f32 %v2697_v59, %v2685_v42  ;;  %v2711_v30 = vadd.f32 %v2710_v54, %v2686_v61  ;;  %v2663_v50 = vunpack.c.l.bf16 %v1683_v9 }
 0x488   : > { %v2607_v20 = vpop.f32.mrf.mxu2  ;;  %v2636_v31 = vpop.f32.mrf.mxu3 }
 0x489   : > { %v2608_v32 = vadd.f32 %v2607_v20, %v4926_v6  ;;  %v2637_v38 = vadd.f32 %v2636_v31, %v4928_v0  ;;  %v2664_v31 = vunpack.c.h.bf16 %v1683_v9 }
 0x48a   : > { %2940 = vmatpush.bf16.msra.mxu0 %v3676_v36 }
 0x48b   : > { %v2671_v24 = vadd.f32 %v2655_v55, %v2608_v32  ;;  %v2672_v51 = vadd.f32 %v2656_v53, %v2637_v38  ;;  %v3726_v42 = vpop.eup %3725 }
 0x48c   : > { %v2724_v32 = vmul.f32 64.0, %v3726_v42  ;;  %vm2728_vm8 = vweird.f32 %v3726_v42 }
 0x48d   : > { %v2687_v58 = vmax.f32 %v2671_v24, 0.0  ;;  %v2688_v47 = vmax.f32 %v2672_v51, 0.0 }
 0x48e   : > { %v2725_v51 = vsub.f32 1.0, %v2724_v32 }
 0x48f   : > { %v2699_v41 = vadd.f32 %v2698_v63, %v2687_v58  ;;  %v2712_v46 = vadd.f32 %v2711_v30, %v2688_v47 }
 0x490   : > { %v2610_v7 = vpop.f32.mrf.mxu2  ;;  %v2639_v62 = vpop.f32.mrf.mxu3  ;;  %v2726_v58 = vmul.f32 %v3726_v42, %v2725_v51 }
 0x491   : > { %v2611_v56 = vadd.f32 %v2610_v7, %v4926_v6  ;;  %v2640_v40 = vadd.f32 %v2639_v62, %v4928_v0 }
 0x493   : > { %v2673_v12 = vadd.f32 %v2657_v17, %v2611_v56  ;;  %v2674_v33 = vadd.f32 %v2658_v22, %v2640_v40 }
 0x495   : > { %v2689_v43 = vmax.f32 %v2673_v12, 0.0  ;;  %v2690_v27 = vmax.f32 %v2674_v33, 0.0 }
 0x497   : > { %v2700_v3 = vadd.f32 %v2699_v41, %v2689_v43  ;;  %v2713_v19 = vadd.f32 %v2712_v46, %v2690_v27 }
 0x498   : > { %v2612_v44 = vpop.f32.mrf.mxu2  ;;  %v2641_v37 = vpop.f32.mrf.mxu3 }
 0x499   : > { %v2613_v60 = vadd.f32 %v2612_v44, %v4926_v6  ;;  %v2642_v48 = vadd.f32 %v2641_v37, %v4928_v0  ;;  %v3675_v44 = vld [vmem:[%s5036_s11 + $0x8] sm:$0xff]  ;;  %v3674_v37 = vld [vmem:[%s5036_s11] sm:$0xff] }
 0x49a   : > { %2941 = vmatpush.bf16.msra.mxu0 %v3675_v44 }
 0x49b   : > { %v2675_v28 = vadd.f32 %v2659_v16, %v2613_v60  ;;  %v2676_v25 = vadd.f32 %v2660_v34, %v2642_v48  ;;  %v3723_v60 = vld [vmem:[%s5035_s10] ss:$0 sm:$0xff] }
 0x49d   : > { %v2691_v10 = vmax.f32 %v2675_v28, 0.0  ;;  %v2692_v45 = vmax.f32 %v2676_v25, 0.0 }
 0x49e   : > { %2942 = vmatpush.bf16.msra.mxu0 %v3674_v37 }
 0x49f   : > { %v2701_v1 = vadd.f32 %v2700_v3, %v2691_v10  ;;  %v2714_v23 = vadd.f32 %v2713_v19, %v2692_v45 }
 0x4a0   : > { %v2615_v52 = vpop.f32.mrf.mxu2  ;;  %v2644_v13 = vpop.f32.mrf.mxu3 }
 0x4a1   : > { %v2616_v21 = vadd.f32 %v2615_v52, %v4926_v6  ;;  %v2645_v57 = vadd.f32 %v2644_v13, %v4928_v0  ;;  %v3724_v52 = vld [vmem:[%s5037_s12] ss:$0 sm:$0xff] }
 0x4a3   : > { %v2677_v35 = vadd.f32 %v2661_v4, %v2616_v21  ;;  %v2678_v49 = vadd.f32 %v2662_v39, %v2645_v57 }
 0x4a5   : > { %v2693_v59 = vmax.f32 %v2677_v35, 0.0  ;;  %v2694_v54 = vmax.f32 %v2678_v49, 0.0 }
 0x4a7   : > { %v2702_v61 = vadd.f32 %v2701_v1, %v2693_v59  ;;  %v2715_v8 = vadd.f32 %v2714_v23, %v2694_v54 }
 0x4a8   : > { %v2617_v63 = vpop.f32.mrf.mxu2  ;;  %v2646_v30 = vpop.f32.mrf.mxu3 }
 0x4a9   : > { %v2618_v11 = vadd.f32 %v2617_v63, %v4926_v6  ;;  %v2647_v20 = vadd.f32 %v2646_v30, %v4928_v0  ;;  %v2727_v6 = vadd.f32 %v3726_v42, %v2726_v58 }
 0x4ab   : > { %v2679_v38 = vadd.f32 %v2663_v50, %v2618_v11  ;;  %v2680_v55 = vadd.f32 %v2664_v31, %v2647_v20  ;;  %v2729_v41 = vsel %vm2728_vm8, %v3726_v42, %v2727_v6 }
 0x4ad   : > { %v2695_v53 = vmax.f32 %v2679_v38, 0.0  ;;  %v2696_v24 = vmax.f32 %v2680_v55, 0.0 }
 0x4af   : > { %v2703_v7 = vadd.f32 %v2702_v61, %v2695_v53  ;;  %v2716_v17 = vadd.f32 %v2715_v8, %v2696_v24 }
 0x4b1   : > { %v2704_v62 = vrot.slane %v2703_v7, 4  ;;  %v2717_v22 = vrot.slane %v2716_v17, 4 }
 0x4b3   : > { %v2705_v47 = vadd.f32 %v2704_v62, %v2703_v7  ;;  %v2718_v56 = vadd.f32 %v2717_v22, %v2716_v17 }
 0x4b5   : > { %v2706_v40 = vrot.slane %v2705_v47, 2  ;;  %v2719_v15 = vrot.slane %v2718_v56, 2 }
 0x4b7   : > { %v2707_v18 = vadd.f32 %v2706_v40, %v2705_v47  ;;  %v2720_v12 = vadd.f32 %v2719_v15, %v2718_v56 }
 0x4b9   : > { %v2708_v0 = vrot.slane %v2707_v18, 1  ;;  %v2721_v33 = vrot.slane %v2720_v12, 1 }
 0x4bb   : > { %v2709_v46 = vadd.f32 %v2708_v0, %v2707_v18  ;;  %v2722_v43 = vadd.f32 %v2721_v33, %v2720_v12 }
 0x4bd   : > { %v2730_v27 = vmul.f32 %v2729_v41, %v2709_v46  ;;  %v2731_v14 = vmul.f32 %v2729_v41, %v2722_v43 }
 0x4bf   : > { %v3529_v3 = vpack.c.bf16 %v2730_v27, %v2730_v27  ;;  %v3532_v19 = vpack.c.bf16 %v2731_v14, %v2731_v14 }
 0x4c1   : > { %3530 = vmatmul.msk.bf16.vlgmr.msrb.gmra.mxu0 %vm3528_vm9, %v3529_v3  ;;  %3533 = vmatmul.msk.bf16.vlgmr.msrb.gmra.mxu1 %vm3528_vm9, %v3532_v19 }
 0x53e   : > { %v2877_v48 = vpop.f32.mrf.mxu0  ;;  %v2890_v16 = vpop.f32.mrf.mxu1 }
 0x53f   : > { %v2878_v34 = vadd.f32 %v3723_v60, %v2877_v48 }
 0x541   : > { %v2891_v28 = vadd.f32 %v2890_v16, %v2878_v34 }
 0x543   : > { %v2894_v25 = vmax.f32 %v2891_v28, 0.0 }
 0x545   : > { %v2895_v4 = vpack.c.bf16 %v2894_v25, %v2894_v25 }
 0x546   : > { %v2879_v29 = vpop.f32.mrf.mxu0  ;;  %v2892_v2 = vpop.f32.mrf.mxu1 }
 0x547   : > { %3550 = vmatmul.msk.bf16.vlgmr.msra.gmra.mxu0 %vm1576_vm7, %v2895_v4 }
 0x5c4   : > { %v2944_v13 = vpop.f32.mrf.mxu0 }
 0x5c5   : > { %v2945_v39 = vadd.f32 %v3724_v52, %v2944_v13 }
 0x5c7   : > { %2949 = vst.msk [vmem:[%s432_s30] sm:$0x1] %vm2948_vm10, %v2945_v39 }
 0x5c8   : > { %3755 = shalt.err (!%p3752_p3)
}
 0x5c9   : > { %3678 = dma.vmem_to_hbm [thread:$0]  (%p3904_p5), %s2962_s20, 16, %s2964_s17, %s2951_s23  }
 0x5cc   : > { %v2946_v26 = vpop.f32.mrf.mxu0 }
 0x5cd PF: > { %s5051_s25 = sld [smem:[#allocation5_spill]]  ;;  %p3684_p4 = scmp.ge.s32.totalorder %s3790_s28, 2 }
 0x5cf   : > { %p3681_p7 = pnand %p3684_p4, %p3908_p6 }
 0x5d1   : > { %p3682_p8 = pneg %p3681_p7 }
 0x5d3   : > { %s2975_s16 = sand.u32 1, %s5051_s25  }
 0x5d4   : > { %s2976_s30 = scalar_lea.sflag [#allocation3], %s2975_s16 }
 0x5d5   : > { %3773 = dma.done.wait (%p3682_p8), %s2976_s30, 16  }
 0x5d6   : > { %3775 = vsyncadd (%p3682_p8), %s2976_s30, 4294967280  ;;  %s5053_s28 = sld [smem:[#allocation7_spill]]  ;;  %s5056_s25 = smov %s3782_s26 }
 0x5d7   : > { %s5054_s22 = sld [smem:[#allocation6_spill]] }
 0x5d8   : > { %s5055_s27 = sld [smem:[#allocation8_spill]] }
 0x5dc   : > { %p23_p9 = scmp.ge.s32.totalorder %s5053_s28, 4  }
 0x5dd   : > { %s5057_s26 = smov %s5054_s22 }
 0x5de   :  { %25 = sbr.rel (!%p23_p9) target bundleno = 3 (0x3), region = 107 }
 0x5e3   :  { %2981 = vsyncpa [#allocation3], 1 }
 0x5e4   :  { %2983 = vsyncpa [#allocation3 + $0x1], 1 }

</bundles_post_ra>
